<compile_context>
chip_gen: v5e
topology: v5e:2x2
jax: 0.10.0
libtpu: 0.0.40
codegen_flags: <defaults>
</compile_context>

<pallas_src>
import functools

import jax
import jax.numpy as jnp
import numpy as np
from jax.experimental import pallas as pl
from jax.experimental.pallas import tpu as pltpu


def _round_up(x, m):
    return (x + m - 1) // m * m


def _residual_kernel(xp_ref, w1_ref, w2_ref, o_ref, *, Wp, Lout):
    """One batch-block per grid step.

    xp_ref: (1, Cin, Lin)   f32  zero-padded input, Nb padded images folded
                                 back-to-back on the lane axis (+ zero tail)
    w1_ref: (Cr, 9*Cin)     bf16 K-stacked 3x3 taps, col = (kh*3+kw)*Cin + cin
    w2_ref: (Cout, Cr)      bf16 1x1 conv
    o_ref : (1, Cout, Lout) f32  output slab (junk rows/cols dropped in wrapper)
    """
    # First ReLU; pad zeros stay zero, so the shifted tap slices stay correct.
    hb = jnp.maximum(xp_ref[0], 0.0).astype(jnp.bfloat16)            # (Cin, Lin)

    # "im2col on VMEM data": 9 lane-shifted views stacked along the contraction
    # (sublane) axis -> a single K = 9*Cin matmul on the MXU.
    rhs = jnp.concatenate(
        [hb[:, kh * Wp + kw: kh * Wp + kw + Lout]
         for kh in range(3) for kw in range(3)],
        axis=0)                                                       # (9*Cin, Lout)

    y1 = jnp.dot(w1_ref[...], rhs, preferred_element_type=jnp.float32)   # (Cr, Lout) f32
    y1 = jnp.maximum(y1, 0.0).astype(jnp.bfloat16)                    # second ReLU
    y2 = jnp.dot(w2_ref[...], y1, preferred_element_type=jnp.float32)    # (Cout, Lout) f32

    # Residual add with the original (un-ReLU'd) input in f32: re-read the
    # center-tap slice from the ref here so xp is not live across the matmuls.
    x_res = xp_ref[0, :, pl.ds(Wp + 1, Lout)]                         # (Cin, Lout) f32
    o_ref[0] = (x_res + y2).astype(o_ref.dtype)


def residual_forward(x, w1, w2, *, num_blocks=None):
    """x: (N, Cin, H, W) f32; w1: (Cr, Cin, 3, 3); w2: (Cout, Cr, 1, 1) -> (N, Cout, H, W)."""
    N, Cin, H, W = x.shape
    Cr = w1.shape[0]
    Cout = w2.shape[0]
    assert Cout == Cin, "residual add requires num_hiddens == in_channels"
    assert w1.shape == (Cr, Cin, 3, 3) and w2.shape == (Cout, Cr, 1, 1)

    # 2 equal "parallel" blocks when possible (v7x has 2 TensorCores); else 1.
    if num_blocks is None:
        num_blocks = 2 if (N >= 2 and N % 2 == 0) else 1
    assert N % num_blocks == 0
    Nb = N // num_blocks

    # Padded geometry for k=3, s=1, p=1: 1 top / 2 bottom zero rows and 1 left /
    # 1 right zero cols. The extra bottom row keeps every shifted tap slice
    # inside its own image, so images can be folded back-to-back on lanes.
    Wp, Hp = W + 2, H + 3
    PF = Hp * Wp                         # padded pixels per image
    max_off = 2 * Wp + 2                 # largest 3x3 tap offset (kh=2, kw=2)
    assert H * Wp - 1 + max_off < PF, "tap offsets must stay inside one padded image"

    L = Nb * PF                          # lanes carrying data per block
    Lout = _round_up(L, 128)             # lane-dense output slab (unmasked stores)
    Lin = _round_up(Lout + max_off, 128)  # input slab incl. shift/residual tail
    assert Lout + max_off <= Lin and Wp + 1 + Lout <= Lin

    # Wrapper-side data movement: zero-pad, fold batch onto the lane axis.
    xp = jnp.pad(x.astype(jnp.float32), ((0, 0), (0, 0), (1, 2), (1, 1)))  # (N,Cin,Hp,Wp)
    xp = xp.reshape(num_blocks, Nb, Cin, PF)
    xp = jnp.transpose(xp, (0, 2, 1, 3)).reshape(num_blocks, Cin, L)
    xp = jnp.pad(xp, ((0, 0), (0, 0), (0, Lin - L)))                       # zero tail

    # Weights: 3x3 -> K-stacked (Cr, 9*Cin); 1x1 -> (Cout, Cr); bf16 for the MXU.
    w1_stk = jnp.transpose(w1, (0, 2, 3, 1)).reshape(Cr, 9 * Cin).astype(jnp.bfloat16)
    w2_mat = w2.reshape(Cout, Cr).astype(jnp.bfloat16)

    kernel = functools.partial(_residual_kernel, Wp=Wp, Lout=Lout)

    # VMEM budget from actual block sizes (double-buffered I/O + intermediates),
    # clamped to v7x's 64 MiB physical VMEM.
    in_bytes = Cin * Lin * 4
    out_bytes = Cout * Lout * 4
    w_bytes = (Cr * 9 * Cin + Cout * Cr) * 2
    interm_bytes = (Cin * Lin * 2            # hb (bf16)
                    + 9 * Cin * Lout * 2     # stacked rhs (bf16)
                    + Cr * Lout * (4 + 2)    # conv1 acc f32 + y1 bf16
                    + Cout * Lout * 4)       # y2 f32
    vmem_limit = 2 * (2 * (in_bytes + out_bytes) + w_bytes + interm_bytes)
    vmem_limit = int(min(64 * 2 ** 20, max(16 * 2 ** 20, vmem_limit)))

    out_slab = pl.pallas_call(
        kernel,
        out_shape=jax.ShapeDtypeStruct((num_blocks, Cout, Lout), jnp.float32),
        grid_spec=pltpu.PrefetchScalarGridSpec(
            num_scalar_prefetch=0,
            grid=(num_blocks,),
            in_specs=[
                pl.BlockSpec((1, Cin, Lin), lambda b: (b, 0, 0)),
                pl.BlockSpec((Cr, 9 * Cin), lambda b: (0, 0)),   # VMEM-resident weights
                pl.BlockSpec((Cout, Cr), lambda b: (0, 0)),      # VMEM-resident weights
            ],
            out_specs=pl.BlockSpec((1, Cout, Lout), lambda b: (b, 0, 0)),
        ),
        compiler_params=pltpu.CompilerParams(
            dimension_semantics=("parallel",),
            vmem_limit_bytes=vmem_limit,
        ),
    )(xp, w1_stk, w2_mat)

    # (num_blocks, Cout, Lout) -> per-image (Hp, Wp) slabs -> drop junk -> NCHW.
    out = out_slab[:, :, :L].reshape(num_blocks, Cout, Nb, Hp, Wp)[:, :, :, :H, :W]
    return jnp.transpose(out, (0, 2, 1, 3, 4)).reshape(N, Cout, H, W)


def residual_ref(x, w1, w2):
    """Pure-JAX (f32) reference of the PyTorch module."""
    h = jnp.maximum(x, 0.0)
    y = jax.lax.conv_general_dilated(h, w1, (1, 1), ((1, 1), (1, 1)),
                                     dimension_numbers=("NCHW", "OIHW", "NCHW"))
    y = jnp.maximum(y, 0.0)
    y = jax.lax.conv_general_dilated(y, w2, (1, 1), "VALID",
                                     dimension_numbers=("NCHW", "OIHW", "NCHW"))
    return x + y


def make_conv_weight(key, cout, cin, k):
    fan_in = cin * k * k
    bound = (1.0 / fan_in) ** 0.5
    return jax.random.uniform(key, (cout, cin, k, k), minval=-bound, maxval=bound,
                              dtype=jnp.float32)


if __name__ == "__main__":
    key = jax.random.PRNGKey(0)
    kx, k1, k2 = jax.random.split(key, 3)

    N, Cin, H, W = 4, 32, 16, 16      # in_channels == num_hiddens == 32
    Cr = 16                           # num_residual_hiddens

    x = jax.random.normal(kx, (N, Cin, H, W), dtype=jnp.float32)
    w1 = make_conv_weight(k1, Cr, Cin, 3)   # Conv2d(Cin -> Cr, 3x3, pad=1, no bias)
    w2 = make_conv_weight(k2, Cin, Cr, 1)   # Conv2d(Cr -> Cin, 1x1, no bias)

    y_ref = residual_ref(x, w1, w2)

    # Default path: 2 parallel blocks (v7x megacore), Nb=2 images folded per block.
    y = residual_forward(x, w1, w2)
    jax.block_until_ready(y)
    assert y.shape == (N, Cin, H, W), y.shape
    np.testing.assert_allclose(np.asarray(y), np.asarray(y_ref), atol=1e-1, rtol=1e-1)

    # Single-block path (whole batch folded into one step; preferred on v5e/v6e).
    y1b = residual_forward(x, w1, w2, num_blocks=1)
    jax.block_until_ready(y1b)
    np.testing.assert_allclose(np.asarray(y1b), np.asarray(y_ref), atol=1e-1, rtol=1e-1)

    print("KERNEL_OK")
</pallas_src>

<mosaic_0001>
module attributes {stable_mosaic.version = 11 : i64} {
  func.func @_residual_kernel(%arg0: i32, %arg1: memref<1x32x896xf32, #tpu.memory_space<vmem>>, %arg2: memref<16x288xbf16, #tpu.memory_space<vmem>>, %arg3: memref<32x16xbf16, #tpu.memory_space<vmem>>, %arg4: memref<1x32x768xf32, #tpu.memory_space<vmem>>) attributes {dimension_semantics = [#tpu.dimension_semantics<parallel>], iteration_bounds = array<i64: 2>, scalar_prefetch = 0 : i64, scratch_operands = 0 : i64, tpu.core_type = #tpu.core_type<tc>, window_params = [{transform_indices = @transform_0, window_bounds = array<i64: 1, 32, 896>}, {pipeline_mode = #tpu.pipeline_mode<synchronous>, transform_indices = @transform_1, window_bounds = array<i64: 16, 288>}, {pipeline_mode = #tpu.pipeline_mode<synchronous>, transform_indices = @transform_2, window_bounds = array<i64: 32, 16>}, {transform_indices = @transform_3, window_bounds = array<i64: 1, 32, 768>}]} {
    %c0 = arith.constant 0 : index
    %c0_0 = arith.constant 0 : index
    %c0_1 = arith.constant 0 : index
    %0 = vector.load %arg1[%c0, %c0_0, %c0_1] : memref<1x32x896xf32, #tpu.memory_space<vmem>>, vector<1x32x896xf32>
    %1 = vector.shape_cast %0 : vector<1x32x896xf32> to vector<32x896xf32>
    %cst = arith.constant 0.000000e+00 : f32
    %2 = vector.broadcast %cst : f32 to vector<32x896xf32>
    %3 = arith.maximumf %1, %2 : vector<32x896xf32>
    %4 = arith.truncf %3 : vector<32x896xf32> to vector<32x896xbf16>
    %5 = vector.extract_strided_slice %4 {offsets = [0, 0], sizes = [32, 768], strides = [1, 1]} : vector<32x896xbf16> to vector<32x768xbf16>
    %6 = vector.extract_strided_slice %4 {offsets = [0, 1], sizes = [32, 768], strides = [1, 1]} : vector<32x896xbf16> to vector<32x768xbf16>
    %7 = vector.extract_strided_slice %4 {offsets = [0, 2], sizes = [32, 768], strides = [1, 1]} : vector<32x896xbf16> to vector<32x768xbf16>
    %8 = vector.extract_strided_slice %4 {offsets = [0, 18], sizes = [32, 768], strides = [1, 1]} : vector<32x896xbf16> to vector<32x768xbf16>
    %9 = vector.extract_strided_slice %4 {offsets = [0, 19], sizes = [32, 768], strides = [1, 1]} : vector<32x896xbf16> to vector<32x768xbf16>
    %10 = vector.extract_strided_slice %4 {offsets = [0, 20], sizes = [32, 768], strides = [1, 1]} : vector<32x896xbf16> to vector<32x768xbf16>
    %11 = vector.extract_strided_slice %4 {offsets = [0, 36], sizes = [32, 768], strides = [1, 1]} : vector<32x896xbf16> to vector<32x768xbf16>
    %12 = vector.extract_strided_slice %4 {offsets = [0, 37], sizes = [32, 768], strides = [1, 1]} : vector<32x896xbf16> to vector<32x768xbf16>
    %13 = vector.extract_strided_slice %4 {offsets = [0, 38], sizes = [32, 768], strides = [1, 1]} : vector<32x896xbf16> to vector<32x768xbf16>
    %14 = tpu.concatenate %5, %6, %7, %8, %9, %10, %11, %12, %13 in 0 : vector<32x768xbf16>, vector<32x768xbf16>, vector<32x768xbf16>, vector<32x768xbf16>, vector<32x768xbf16>, vector<32x768xbf16>, vector<32x768xbf16>, vector<32x768xbf16>, vector<32x768xbf16> -> vector<288x768xbf16>
    %c0_2 = arith.constant 0 : index
    %c0_3 = arith.constant 0 : index
    %15 = vector.load %arg2[%c0_2, %c0_3] : memref<16x288xbf16, #tpu.memory_space<vmem>>, vector<16x288xbf16>
    %cst_4 = arith.constant dense<0.000000e+00> : vector<16x768xf32>
    %16 = tpu.matmul %15, %14, %cst_4 {dimension_numbers = #tpu.dot_dimension_numbers<[1], [0], [0], [1], [0, 0, 1, 1], [], []>} : vector<16x288xbf16>, vector<288x768xbf16>, vector<16x768xf32> -> vector<16x768xf32>
    %cst_5 = arith.constant 0.000000e+00 : f32
    %17 = vector.broadcast %cst_5 : f32 to vector<16x768xf32>
    %18 = arith.maximumf %16, %17 : vector<16x768xf32>
    %19 = arith.truncf %18 : vector<16x768xf32> to vector<16x768xbf16>
    %c0_6 = arith.constant 0 : index
    %c0_7 = arith.constant 0 : index
    %20 = vector.load %arg3[%c0_6, %c0_7] : memref<32x16xbf16, #tpu.memory_space<vmem>>, vector<32x16xbf16>
    %cst_8 = arith.constant dense<0.000000e+00> : vector<32x768xf32>
    %21 = tpu.matmul %20, %19, %cst_8 {dimension_numbers = #tpu.dot_dimension_numbers<[1], [0], [0], [1], [0, 0, 1, 1], [], []>} : vector<32x16xbf16>, vector<16x768xbf16>, vector<32x768xf32> -> vector<32x768xf32>
    %c0_9 = arith.constant 0 : index
    %c0_10 = arith.constant 0 : index
    %c19 = arith.constant 19 : index
    %22 = vector.load %arg1[%c0_9, %c0_10, %c19] : memref<1x32x896xf32, #tpu.memory_space<vmem>>, vector<1x32x768xf32>
    %23 = vector.shape_cast %22 : vector<1x32x768xf32> to vector<32x768xf32>
    %24 = arith.addf %23, %21 : vector<32x768xf32>
    %c0_11 = arith.constant 0 : index
    %c0_12 = arith.constant 0 : index
    %c0_13 = arith.constant 0 : index
    %25 = vector.load %arg4[%c0_11, %c0_12, %c0_13] : memref<1x32x768xf32, #tpu.memory_space<vmem>>, vector<1x32x768xf32>
    %26 = vector.shape_cast %25 : vector<1x32x768xf32> to vector<32x768xf32>
    %27 = vector.shape_cast %24 : vector<32x768xf32> to vector<1x32x768xf32>
    tpu.vector_store %arg4[%c0_11, %c0_12, %c0_13], %27 {strides = array<i32>} : memref<1x32x768xf32, #tpu.memory_space<vmem>>, vector<1x32x768xf32>,
    return
  }
  func.func @transform_0(%arg0: i32) -> (i32, i32, i32) {
    %c0_i32 = arith.constant 0 : i32
    %c0_i32_0 = arith.constant 0 : i32
    %c0_i32_1 = arith.constant 0 : i32
    return %arg0, %c0_i32, %c0_i32_0 : i32, i32, i32
  }
  func.func @transform_1(%arg0: i32) -> (i32, i32) {
    %c0_i32 = arith.constant 0 : i32
    %c0_i32_0 = arith.constant 0 : i32
    %c0_i32_1 = arith.constant 0 : i32
    return %c0_i32, %c0_i32_0 : i32, i32
  }
  func.func @transform_2(%arg0: i32) -> (i32, i32) {
    %c0_i32 = arith.constant 0 : i32
    %c0_i32_0 = arith.constant 0 : i32
    %c0_i32_1 = arith.constant 0 : i32
    return %c0_i32, %c0_i32_0 : i32, i32
  }
  func.func @transform_3(%arg0: i32) -> (i32, i32, i32) {
    %c0_i32 = arith.constant 0 : i32
    %c0_i32_0 = arith.constant 0 : i32
    %c0_i32_1 = arith.constant 0 : i32
    return %arg0, %c0_i32, %c0_i32_0 : i32, i32, i32
  }
}

</mosaic_0001>

<bundles_post_ra>
// kernel: tpu_custom_call.1
= control target key start
LH: loop header
LB: loop body
LE: loop exit
PB: predicated region body
PF: predicated region fallthrough
CT: control target
= control target key end

     0   :  { %8 = vsyncpa [#allocation3], 0  ;;  %s2834_s0 = inlined_call_operand.hbm [shape: f32[2,32,896], index: 0, kind: input, shape index: {}]   ;;  %s2835_s1 = inlined_call_operand.vmem [shape: bf16[16,288], index: 1, kind: input, shape index: {}]   ;;  %s2836_s2 = inlined_call_operand.vmem [shape: bf16[32,16], index: 2, kind: input, shape index: {}]   ;;  %s2837_s3 = inlined_call_operand.hbm [shape: f32[2,32,768], index: 3, kind: output, shape index: {}]  }
   0x1   :  { %10 = vsyncpa [#allocation3 + $0x1], 0 }
   0x2   :  { %11 = vsyncpa [#allocation4], 0 }
   0x3   :  { %13 = vsyncpa [#allocation4 + $0x1], 0  ;;  %s1855_s12 = smov 0   ;;  %s1857_s13 = smov 0  }
   0x4   :  { %s1859_s14 = smov 0   ;;  %s1861_s15 = smov 0  }
   0x5 LB: > { %s1876_s16 = sadd.s32 4294967295, %s1820_s15   ;;  %s1581_s17 = sadd.s32 4294967294, %s1820_s15   ;;  %s1820_s15 = sphi %s1861_s15, %s2845_s15   ;;  %s1816_s14 = sphi %s1859_s14, %s2844_s14   ;;  %s1812_s13 = sphi %s1857_s13, %s2843_s13   ;;  %s1808_s12 = sphi %s1855_s12, %s2842_s12  }
   0x6   : > { %s1880_s18 = sadd.s32 1, %s1820_s15   ;;  %s26_s19 = sadd.s32 1, %s1816_s14 }
   0x7   : > { %s23_s20 = ssub.s32 %s1820_s15, %s1880_s18  ;;  %p33_p0 = scmp.ne.s32.totalorder %s1816_s14, %s1812_s13 }
   0x8   : > { %p24_p1 = scmp.eq.s32.totalorder %s23_s20, 0  ;;  %p34_p2 = scmp.eq.s32.totalorder %s1820_s15, 0 }
   0x9   : > { %p39_p3 = scmp.ne.s32.totalorder %s1812_s13, %s1808_s12  ;;  %p40_p4 = scmp.eq.s32.totalorder %s1876_s16, 0 }
   0xa   : > { %s1892_s21 = scalar_select %p24_p1, %s1816_s14, %s26_s19  }
   0xb   : > { %p35_p5 = por %p34_p2, %p33_p0  ;;  %p1894_p6 = por %p40_p4, %p39_p3 }
   0xc   : > { %p105_p7 = scmp.eq.s32.totalorder %s1876_s16, 1  ;;  %p111_p8 = scmp.eq.s32.totalorder %s1581_s17, 1 }
   0xd   : > { %p1583_p9 = scmp.ge.s32.totalorder %s1820_s15, 2  ;;  %p1649_p10 = scmp.lt.s32.totalorder %s1820_s15, 2 }
   0xe   : > { %p1901_p11 = por %p105_p7, %p33_p0  ;;  %p1905_p12 = por %p111_p8, %p39_p3 }
   0xf   : > { %s137_s25 = sand.u32 1, %s1816_s14   ;;  %s1633_s26 = smul.u32 224, %s1820_s15 }
  0x10   : > { %s1632_s27 = smul.u32 224, %s137_s25  ;;  %p1914_p13 = pnand %p1649_p10, %p35_p5 }
  0x11   : > { %s146_s30 = scalar_lea.hbm %s2834_s0, %s1633_s26  ;;  %s138_s8 = scalar_lea.sflag [#allocation3], %s137_s25 }
  0x12   : > { %s147_s5 = sshll.u32 %s146_s30, 4  ;;  %s141_s6 = scalar_lea.vmem [#allocation2], %s1632_s27  ;;  %s148_s5 = int_to_ptr.hbm [resolvable:$true] %s147_s5 }
  0x13   : > { %s149_s7 = sshll.u32 %s141_s6, 4  ;;  %s1724_s9 = sshra.s32 %s148_s5, 4  ;;  %s150_s7 = int_to_ptr.vmem [resolvable:$true] %s149_s7  ;;  %s1725_s9 = int_to_ptr.hbm [resolvable:$true] %s1724_s9 }
  0x14   : > { %s1726_s10 = scalar_lea.hbm %s1725_s9, 224  ;;  %p1728_p1 = pneg %p1914_p13 }
  0x15   : > { %p1727_p0 = scmp.ne.s32.totalorder %s1725_s9, %s1726_s10  ;;  %s1731_s19 = scalar_lea.hbm %s2834_s0, 448 }
  0x16   : > { %p1732_p4 = scmp.lt.s32.totalorder %s1725_s9, %s2834_s0  ;;  %p1733_p5 = scmp.lt.s32.totalorder %s1731_s19, %s1726_s10 }
  0x17   : > { %p1729_p2 = pnand %p1728_p1, %p1727_p0 }
  0x18   : > { %p1734_p7 = por %p1733_p5, %p1732_p4 }
  0x19   : > { %p1730_p3 = pneg %p1729_p2 }
  0x1b   : > { %p1735_p8 = pnand %p1734_p7, %p1730_p3 }
  0x1d   : > { %1738 = shalt.err (!%p1735_p8)
}
  0x1e   : > { %s1822_s25 = smov 896   ;;  %s1823_s27 = smov 56  }
  0x1f   : > { %1644 = dma.hbm_to_vmem [thread:$0]  (!%p1914_p13), %s148_s5, 3584, %s150_s7, %s138_s8, %s1822_s25, %s1822_s25, %s1823_s27  }
  0x20   : > { %p1585_p10 = scmp.ge.s32.totalorder %s1820_s15, 1  ;;  %p157_p0 = scmp.lt.s32.totalorder %s1820_s15, 3 }
  0x22   : > { %p158_p1 = pnand %p1585_p10, %p157_p0 }
  0x23   : > { %s1931_s28 = sand.u32 (!%p158_p1), 1, %s1812_s13  }
  0x24   : > { %161 = sbr.rel (%p158_p1) target bundleno = 1009 (0x3f1), region = 32  ;;  %s164_s30 = scalar_lea.sflag (!%p158_p1), [#allocation3], %s1931_s28 }
  0x25   : > { %s1634_s29 = smul.u32 (!%p158_p1), 224, %s1931_s28 }
  0x27   : > { %s1935_s6 = scalar_lea.vmem (!%p158_p1), [#allocation2], %s1634_s29 }
  0x29   : > { %1799 = dma.done.wait (%p1894_p6), %s164_s30, 3584  }
  0x2a   : > { %1801 = vsyncadd (%p1894_p6), %s164_s30, 4294963712  ;;  %v206_v0 = vld [vmem:[%s1935_s6 + $0x70] sm:$0xff]  ;;  %v207_v1 = vld [vmem:[%s1935_s6 + $0x78] sm:$0xff]  ;;  %s1824_s22 = smov 91   ;;  %s1825_s4 = smov 92   ;;  %vm680_vm0 = vcmask 744448  }
  0x2b   : > { %v213_v2 = vld [vmem:[%s1935_s6 + $0xa8] sm:$0xff]  ;;  %v214_v3 = vld [vmem:[%s1935_s6 + $0xb0] sm:$0xff]  ;;  %v234_v4 = vmax.f32 %v206_v0, 0.0  ;;  %v235_v5 = vmax.f32 %v207_v1, 0.0  ;;  %v192_v7 = vld [vmem:[%s1935_s6] sm:$0xff]  ;;  %s1826_s5 = smov 90  }
  0x2c   : > { %v241_v6 = vmax.f32 %v213_v2, 0.0  ;;  %v193_v8 = vld [vmem:[%s1935_s6 + $0x8] sm:$0xff]  ;;  %v242_v9 = vmax.f32 %v214_v3, 0.0  ;;  %v199_v10 = vld [vmem:[%s1935_s6 + $0x38] sm:$0xff]  ;;  %v200_v11 = vld [vmem:[%s1935_s6 + $0x40] sm:$0xff]  ;;  %v220_v12 = vmax.f32 %v192_v7, 0.0 }
  0x2d   : > { %v221_v13 = vmax.f32 %v193_v8, 0.0  ;;  %v208_v14 = vld [vmem:[%s1935_s6 + $0x80] sm:$0xff]  ;;  %v256_v15 = vpack.c.bf16 %v235_v5, %v234_v4  ;;  %v227_v16 = vmax.f32 %v199_v10, 0.0  ;;  %v228_v17 = vmax.f32 %v200_v11, 0.0  ;;  %v209_v18 = vld [vmem:[%s1935_s6 + $0x88] sm:$0xff]  ;;  %v215_v19 = vld [vmem:[%s1935_s6 + $0xb8] sm:$0xff] }
  0x2e   : > { %v216_v20 = vld [vmem:[%s1935_s6 + $0xc0] sm:$0xff]  ;;  %v236_v21 = vmax.f32 %v208_v14, 0.0  ;;  %v260_v22 = vpack.c.bf16 %v242_v9, %v241_v6  ;;  %v237_v24 = vmax.f32 %v209_v18, 0.0  ;;  %v243_v25 = vmax.f32 %v215_v19, 0.0  ;;  %v194_v26 = vld [vmem:[%s1935_s6 + $0x10] sm:$0xff]  ;;  %v195_v27 = vld [vmem:[%s1935_s6 + $0x18] sm:$0xff] }
  0x2f   : > { %v248_v23 = vpack.c.bf16 %v221_v13, %v220_v12  ;;  %v289_v28 = vunpack.c.h.b16 %v256_v15  ;;  %v288_v29 = vunpack.c.l.b16 %v256_v15  ;;  %v252_v30 = vpack.c.bf16 %v228_v17, %v227_v16  ;;  %v201_v32 = vld [vmem:[%s1935_s6 + $0x48] sm:$0xff]  ;;  %v202_v37 = vld [vmem:[%s1935_s6 + $0x50] sm:$0xff]  ;;  %s1827_s7 = smov 110   ;;  %s1828_s8 = smov 108   ;;  %v211_v11 = vld [vmem:[%s1935_s6 + $0x98] sm:$0xff] }
  0x30   : > { %v244_v31 = vmax.f32 %v216_v20, 0.0  ;;  %v295_v33 = vunpack.c.h.b16 %v260_v22  ;;  %v294_v34 = vunpack.c.l.b16 %v260_v22  ;;  %v257_v36 = vpack.c.bf16 %v237_v24, %v236_v21  ;;  %s1829_s9 = smov 109   ;;  %s1830_s10 = smov 126   ;;  %v210_v10 = vld [vmem:[%s1935_s6 + $0x90] sm:$0xff]  ;;  %v217_v12 = vld [vmem:[%s1935_s6 + $0xc8] sm:$0xff]  ;;  %v196_v24 = vld [vmem:[%s1935_s6 + $0x20] sm:$0xff] }
  0x31   : > { %v277_v35 = vunpack.c.h.b16 %v248_v23  ;;  %v283_v38 = vunpack.c.h.b16 %v252_v30  ;;  %v222_v40 = vmax.f32 %v194_v26, 0.0  ;;  %v223_v41 = vmax.f32 %v195_v27, 0.0  ;;  %s1831_s11 = smov 127   ;;  %v218_v13 = vld [vmem:[%s1935_s6 + $0xd0] sm:$0xff]  ;;  %v203_v26 = vld [vmem:[%s1935_s6 + $0x58] sm:$0xff]  ;;  %v204_v27 = vld [vmem:[%s1935_s6 + $0x60] sm:$0xff] }
  0x32   : > { %v261_v39 = vpack.c.bf16 %v244_v31, %v243_v25  ;;  %v1957_v42 = vpack.c.b16 %v295_v33, %v289_v28  ;;  %v1959_v43 = vpack.c.b16 %v294_v34, %v288_v29  ;;  %v229_v44 = vmax.f32 %v201_v32, 0.0  ;;  %v197_v25 = vld [vmem:[%s1935_s6 + $0x28] sm:$0xff]  ;;  %s1832_s19 = smov 19   ;;  %s1635_s20 = smul.u32 192, %s1931_s28 }
  0x33   : > { %v1961_v45 = vpack.c.b16 %v283_v38, %v277_v35  ;;  %v230_v46 = vmax.f32 %v202_v37, 0.0  ;;  %v249_v47 = vpack.c.bf16 %v223_v41, %v222_v40  ;;  %v290_v48 = vunpack.c.l.b16 %v257_v36  ;;  %s1493_s30 = scalar_lea.sflag [#allocation4], %s1931_s28 }
  0x34   : > { %668 = vrot.lane.b32.xlu0 %v1957_v42, %s1824_s22  ;;  %666 = vrot.lane.b32.xlu2 %v1959_v43, %s1824_s22  ;;  %v296_v49 = vunpack.c.l.b16 %v261_v39  ;;  %v276_v55 = vunpack.c.l.b16 %v248_v23  ;;  %v282_v56 = vunpack.c.l.b16 %v252_v30  ;;  %v291_v61 = vunpack.c.h.b16 %v257_v36  ;;  %s2748_s26 = scalar_lea.vmem [#allocation5], %s1635_s20 }
  0x35   : > { %654 = vrot.lane.b32.xlu1 %v1961_v45, %s1824_s22  ;;  %v253_v50 = vpack.c.bf16 %v230_v46, %v229_v44  ;;  %v278_v51 = vunpack.c.l.b16 %v249_v47  ;;  %v279_v58 = vunpack.c.h.b16 %v249_v47  ;;  %v297_v62 = vunpack.c.h.b16 %v261_v39 }
  0x36   : > { %v1969_v53 = vpack.c.b16 %v296_v49, %v290_v48  ;;  %v1985_v57 = vpack.c.b16 %v282_v56, %v276_v55  ;;  %v238_v14 = vmax.f32 %v210_v10, 0.0  ;;  %v239_v15 = vmax.f32 %v211_v11, 0.0 }
  0x37   : > { %v284_v52 = vunpack.c.l.b16 %v253_v50  ;;  %v285_v59 = vunpack.c.h.b16 %v253_v50  ;;  %v2019_v63 = vpack.c.b16 %v297_v62, %v291_v61  ;;  %v245_v16 = vmax.f32 %v217_v12, 0.0 }
  0x38   : > { %v246_v17 = vmax.f32 %v218_v13, 0.0  ;;  %vm733_vm1 = vcmask 736256   ;;  %v258_v21 = vpack.c.bf16 %v239_v15, %v238_v14  ;;  %v224_v32 = vmax.f32 %v196_v24, 0.0 }
  0x39   : > { %v1971_v54 = vpack.c.b16 %v284_v52, %v278_v51  ;;  %v2005_v60 = vpack.c.b16 %v285_v59, %v279_v58  ;;  %v225_v33 = vmax.f32 %v197_v25, 0.0  ;;  %v231_v34 = vmax.f32 %v203_v26, 0.0  ;;  %v1596_v25 = vld [vmem:[%s2835_s1 + $0x8] sm:$0xf]  ;;  %v1629_v26 = vld [vmem:[%s2835_s1 + $0x10] sm:$0xf0] }
  0x3a   : > { %v262_v22 = vpack.c.bf16 %v246_v17, %v245_v16  ;;  %v293_v28 = vunpack.c.h.b16 %v258_v21  ;;  %v292_v30 = vunpack.c.l.b16 %v258_v21  ;;  %v232_v35 = vmax.f32 %v204_v27, 0.0 }
  0x3b   : > { %v250_v44 = vpack.c.bf16 %v225_v33, %v224_v32  ;;  %vm627_vm2 = vcmask 752640   ;;  %vm468_vm3 = vcmask 900096   ;;  %vm574_vm4 = vcmask 883712  }
  0x3c   : > { %670 = vrot.lane.b32.xlu0 %v1969_v53, %s1824_s22  ;;  %615 = vrot.lane.b32.xlu2 %v1957_v42, %s1825_s4  ;;  %v299_v29 = vunpack.c.h.b16 %v262_v22  ;;  %v298_v31 = vunpack.c.l.b16 %v262_v22  ;;  %v254_v46 = vpack.c.bf16 %v232_v35, %v231_v34  ;;  %vm777_vm5 = vcmask 261120  }
  0x3d   : > { %656 = vrot.lane.b32.xlu1 %v1971_v54, %s1824_s22  ;;  %v280_v48 = vunpack.c.l.b16 %v250_v44  ;;  %v281_v61 = vunpack.c.h.b16 %v250_v44  ;;  %vm521_vm6 = vcmask 891904   ;;  %vm415_vm7 = vcmask 1031168  }
  0x3e   : > { %v2115_v40 = vpack.c.b16 %v299_v29, %v293_v28  ;;  %v2117_v41 = vpack.c.b16 %v298_v31, %v292_v30  ;;  %v286_v49 = vunpack.c.l.b16 %v254_v46  ;;  %v287_v62 = vunpack.c.h.b16 %v254_v46  ;;  %v212_v30 = vld [vmem:[%s1935_s6 + $0xa0] sm:$0xff]  ;;  %v219_v31 = vld [vmem:[%s1935_s6 + $0xd8] sm:$0xff] }
  0x3f   : > { %v2208_v28 = vor.u32 %v1629_v26, %v1596_v25  ;;  %v240_v32 = vmax.f32 %v212_v30, 0.0  ;;  %v247_v33 = vmax.f32 %v219_v31, 0.0  ;;  %vm362_vm8 = vcmask 1039360  }
  0x40   : > { %v2133_v56 = vpack.c.b16 %v286_v49, %v280_v48  ;;  %v2154_v10 = vpack.c.b16 %v287_v62, %v281_v61  ;;  %v198_v61 = vld [vmem:[%s1935_s6 + $0x30] sm:$0xff]  ;;  %v205_v62 = vld [vmem:[%s1935_s6 + $0x68] sm:$0xff]  ;;  %vm1065_vm9 = vcmask 130048   ;;  %vm1258_vm10 = vcmask 154624  }
  0x41   : > { %v259_v44 = vpack.c.bf16 %v240_v32, %v240_v32  ;;  %v263_v46 = vpack.c.bf16 %v247_v33, %v247_v33 }
  0x43   : > { %v331_v48 = vunpack.c.l.b16 %v263_v46 }
  0x44   : > { %617 = vrot.lane.b32.xlu0 %v1969_v53, %s1825_s4  ;;  %721 = vrot.lane.b32.xlu2 %v1957_v42, %s1826_s5 }
  0x45   : > { %719 = vrot.lane.b32.xlu1 %v1959_v43, %s1826_s5 }
  0x4c   : > { %603 = vrot.lane.b32.xlu2 %v1971_v54, %s1825_s4  ;;  %652 = vrot.lane.b32.xlu0 %v1985_v57, %s1824_s22 }
  0x4d   : > { %601 = vrot.lane.b32.xlu1 %v1961_v45, %s1825_s4 }
  0x54   : > { %613 = vrot.lane.b32.xlu2 %v1959_v43, %s1825_s4  ;;  %705 = vrot.lane.b32.xlu0 %v1985_v57, %s1826_s5 }
  0x55   : > { %707 = vrot.lane.b32.xlu1 %v1961_v45, %s1826_s5 }
  0x5c   : > { %456 = vrot.lane.b32.xlu2 %v1957_v42, %s1827_s7  ;;  %562 = vrot.lane.b32.xlu0 %v1957_v42, %s1828_s8 }
  0x5d   : > { %564 = vrot.lane.b32.xlu1 %v1969_v53, %s1828_s8 }
  0x64   : > { %548 = vrot.lane.b32.xlu2 %v1961_v45, %s1828_s8  ;;  %458 = vrot.lane.b32.xlu0 %v1969_v53, %s1827_s7 }
  0x65   : > { %599 = vrot.lane.b32.xlu1 %v1985_v57, %s1825_s4 }
  0x6c   : > { %444 = vrot.lane.b32.xlu2 %v1971_v54, %s1827_s7  ;;  %550 = vrot.lane.b32.xlu0 %v1971_v54, %s1828_s8 }
  0x6d   : > { %442 = vrot.lane.b32.xlu1 %v1961_v45, %s1827_s7 }
  0x74   : > { %509 = vrot.lane.b32.xlu2 %v1957_v42, %s1829_s9  ;;  %460 = vrot.lane.b32.xlu0 %v2019_v63, %s1827_s7 }
  0x75   : > { %560 = vrot.lane.b32.xlu1 %v1959_v43, %s1828_s8 }
  0x7c   : > { %405 = vrot.lane.b32.xlu2 %v1969_v53, %s1830_s10  ;;  %511 = vrot.lane.b32.xlu0 %v1969_v53, %s1829_s9 }
  0x7d   : > { %403 = vrot.lane.b32.xlu1 %v1957_v42, %s1830_s10 }
  0x84   : > { %495 = vrot.lane.b32.xlu2 %v1961_v45, %s1829_s9  ;;  %446 = vrot.lane.b32.xlu0 %v2005_v60, %s1827_s7 }
  0x85   : > { %546 = vrot.lane.b32.xlu1 %v1985_v57, %s1828_s8 }
  0x8c   : > { %391 = vrot.lane.b32.xlu2 %v1971_v54, %s1830_s10  ;;  %497 = vrot.lane.b32.xlu0 %v1971_v54, %s1829_s9 }
  0x8d   : > { %389 = vrot.lane.b32.xlu1 %v1961_v45, %s1830_s10 }
  0x8e   : > { %v667_v0 = vpop.permute.xlu2 %666 }
  0x94   : > { %350 = vrot.lane.b32.xlu2 %v1957_v42, %s1831_s11  ;;  %407 = vrot.lane.b32.xlu0 %v2019_v63, %s1830_s10 }
  0x95   : > { %507 = vrot.lane.b32.xlu1 %v1959_v43, %s1829_s9 }
  0x96   : > { %v2051_v1 = vpop.permute.xlu2 %615 }
  0x9c   : > { %493 = vrot.lane.b32.xlu2 %v1985_v57, %s1829_s9  ;;  %352 = vrot.lane.b32.xlu0 %v1969_v53, %s1831_s11 }
  0x9d   : > { %393 = vrot.lane.b32.xlu1 %v2005_v60, %s1830_s10 }
  0x9e   : > { %v2059_v2 = vpop.permute.xlu2 %721 }
  0xa4   : > { %338 = vrot.lane.b32.xlu2 %v1971_v54, %s1831_s11  ;;  %672 = vrot.lane.b32.xlu0 %v2019_v63, %s1824_s22 }
  0xa5   : > { %336 = vrot.lane.b32.xlu1 %v1961_v45, %s1831_s11 }
  0xa6   : > { %v2067_v3 = vpop.permute.xlu0 %668  ;;  %v2069_v4 = vpop.permute.xlu2 %603 }
  0xa7   : > { %v2071_v5 = vpop.permute.xlu1 %654  ;;  %v687_v6 = vsel %vm680_vm0, %v667_v0, %v2067_v3 }
  0xa8   : > { %795 = vmatpush.bf16.msra.mxu1 %v687_v6 }
  0xac   : > { %723 = vrot.lane.b32.xlu2 %v1969_v53, %s1826_s5  ;;  %354 = vrot.lane.b32.xlu0 %v2019_v63, %s1831_s11 }
  0xad   : > { %658 = vrot.lane.b32.xlu1 %v2005_v60, %s1824_s22 }
  0xae   : > { %v2081_v7 = vpop.permute.xlu0 %670  ;;  %v614_v8 = vpop.permute.xlu2 %613 }
  0xaf   : > { %v2083_v9 = vpop.permute.xlu1 %656  ;;  %v634_v47 = vsel %vm627_vm2, %v614_v8, %v2051_v1  ;;  %v688_v58 = vsel %vm680_vm0, %v2067_v3, %v2081_v7 }
  0xb0   : > { %v682_v59 = vsel %vm680_vm0, %v2071_v5, %v2083_v9 }
  0xb4   : > { %454 = vrot.lane.b32.xlu2 %v1959_v43, %s1827_s7  ;;  %340 = vrot.lane.b32.xlu0 %v2005_v60, %s1831_s11 }
  0xb5   : > { %619 = vrot.lane.b32.xlu1 %v2019_v63, %s1825_s4 }
  0xb6   : > { %v2095_v18 = vpop.permute.xlu0 %617  ;;  %v2097_v19 = vpop.permute.xlu2 %456 }
  0xb7   : > { %v720_v20 = vpop.permute.xlu1 %719  ;;  %v635_v8 = vsel %vm627_vm2, %v2051_v1, %v2095_v18 }
  0xb8   : > { %v740_v23 = vsel %vm733_vm1, %v720_v20, %v2059_v2 }
  0xb9   : > { %815 = vmatpush.bf16.msra.mxu2 %v740_v23 }
  0xbc   : > { %440 = vrot.lane.b32.xlu2 %v1985_v57, %s1827_s7  ;;  %709 = vrot.lane.b32.xlu0 %v1971_v54, %s1826_s5 }
  0xbd   : > { %605 = vrot.lane.b32.xlu1 %v2005_v60, %s1825_s4 }
  0xbe   : > { %v2111_v36 = vpop.permute.xlu2 %548  ;;  %v653_v37 = vpop.permute.xlu0 %652 }
  0xbf   : > { %v602_v38 = vpop.permute.xlu1 %601  ;;  %v681_v39 = vsel %vm680_vm0, %v653_v37, %v2071_v5 }
  0xc0   : > { %796 = vmatpush.bf16.msra.mxu1 %v681_v39  ;;  %v629_v5 = vsel %vm627_vm2, %v602_v38, %v2069_v4 }
  0xc4   : > { %464 = vrot.lane.b32.xlu2 %v2115_v40, %s1827_s7  ;;  %674 = vrot.lane.b32.xlu0 %v2117_v41, %s1824_s22 }
  0xc5   : > { %462 = vrot.lane.b32.xlu1 %v2117_v41, %s1827_s7  ;;  %797 = vmatpush.bf16.msra.mxu1 %v634_v47  ;;  %v330_v47 = vunpack.c.l.b16 %v259_v44 }
  0xc6   : > { %v2127_v50 = vpop.permute.xlu2 %444  ;;  %v706_v51 = vpop.permute.xlu0 %705 }
  0xc7   : > { %v2129_v52 = vpop.permute.xlu1 %707 }
  0xc8   : > { %v734_v55 = vsel %vm733_vm1, %v706_v51, %v2129_v52 }
  0xc9   : > { %816 = vmatpush.bf16.msra.mxu2 %v734_v55 }
  0xcc   : > { %660 = vrot.lane.b32.xlu2 %v2133_v56, %s1824_s22  ;;  %566 = vrot.lane.b32.xlu0 %v2019_v63, %s1828_s8 }
  0xcd   : > { %837 = vmatpush.bf16.msrb.mxu2 %v688_v58  ;;  %401 = vrot.lane.b32.xlu1 %v1959_v43, %s1830_s10 }
  0xce   : > { %v2147_v0 = vpop.permute.xlu2 %509  ;;  %v563_v3 = vpop.permute.xlu0 %562  ;;  %1598 = vmatmul.msk.bf16.vlgmr.msra.gmra.mxu2 %vm777_vm5, %v2208_v28 }
  0xcf   : > { %v2149_v6 = vpop.permute.xlu1 %564 }
  0xd0   : > { %v582_v15 = vsel %vm574_vm4, %v563_v3, %v2149_v6 }
  0xd1   : > { %838 = vmatpush.bf16.msrb.mxu2 %v682_v59  ;;  %v2243_v59 = vpack.c.b16 %v331_v48, %v330_v47  ;;  %v1590_v48 = vld [vmem:[%s2835_s1 + $0xc] sm:$0xf0] }
  0xd4   : > { %552 = vrot.lane.b32.xlu2 %v2005_v60, %s1828_s8  ;;  %448 = vrot.lane.b32.xlu0 %v2133_v56, %s1827_s7 }
  0xd5   : > { %839 = vmatpush.bf16.msrb.mxu2 %v635_v8  ;;  %450 = vrot.lane.b32.xlu1 %v2154_v10, %s1827_s7  ;;  %v233_v8 = vmax.f32 %v205_v62, 0.0 }
  0xd6   : > { %v2164_v11 = vpop.permute.xlu2 %405  ;;  %v2166_v1 = vpop.permute.xlu0 %458 }
  0xd7   : > { %v600_v12 = vpop.permute.xlu1 %599  ;;  %v476_v13 = vsel %vm468_vm3, %v2097_v19, %v2166_v1 }
  0xd8   : > { %v628_v14 = vsel %vm627_vm2, %v600_v12, %v602_v38  ;;  %823 = vmatpush.bf16.msra.mxu3 %v476_v13 }
  0xd9   : > { %840 = vmatpush.bf16.msrb.mxu2 %v629_v5  ;;  %798 = vmatpush.bf16.msra.mxu1 %v628_v14 }
  0xdc   : > { %725 = vrot.lane.b32.xlu2 %v2019_v63, %s1826_s5  ;;  %387 = vrot.lane.b32.xlu0 %v1985_v57, %s1830_s10 }
  0xdd   : > { %841 = vmatpush.bf16.msrb.mxu2 %v582_v15  ;;  %621 = vrot.lane.b32.xlu1 %v2117_v41, %s1825_s4 }
  0xde   : > { %v2180_v16 = vpop.permute.xlu2 %495  ;;  %v2182_v17 = vpop.permute.xlu0 %550 }
  0xdf   : > { %v2184_v20 = vpop.permute.xlu1 %442  ;;  %v576_v21 = vsel %vm574_vm4, %v2111_v36, %v2182_v17 }
  0xe0   : > { %v470_v22 = vsel %vm468_vm3, %v2184_v20, %v2127_v50 }
  0xe1   : > { %842 = vmatpush.bf16.msrb.mxu2 %v576_v21  ;;  %824 = vmatpush.bf16.msra.mxu3 %v470_v22  ;;  %v255_v21 = vpack.c.bf16 %v233_v8, %v233_v8 }
  0xe3   : > { %v329_v25 = vunpack.c.l.b16 %v255_v21 }
  0xe4   : > { %513 = vrot.lane.b32.xlu2 %v2019_v63, %s1829_s9  ;;  %409 = vrot.lane.b32.xlu0 %v2117_v41, %s1830_s10 }
  0xe5   : > { %411 = vrot.lane.b32.xlu1 %v2115_v40, %s1830_s10 }
  0xe6   : > { %v2198_v23 = vpop.permute.xlu2 %391  ;;  %v2200_v24 = vpop.permute.xlu0 %460 }
  0xe7   : > { %v561_v27 = vpop.permute.xlu1 %560 }
  0xe8   : > { %v581_v29 = vsel %vm574_vm4, %v561_v27, %v563_v3  ;;  %v226_v3 = vmax.f32 %v198_v61, 0.0 }
  0xe9   : > { %799 = vmatpush.bf16.msra.mxu1 %v581_v29 }
  0xea   : > { %v251_v15 = vpack.c.bf16 %v226_v3, %v226_v3 }
  0xec   : > { %711 = vrot.lane.b32.xlu2 %v2005_v60, %s1826_s5  ;;  %348 = vrot.lane.b32.xlu0 %v1959_v43, %s1831_s11  ;;  %v328_v22 = vunpack.c.l.b16 %v251_v15 }
  0xed   : > { %607 = vrot.lane.b32.xlu1 %v2133_v56, %s1825_s4 }
  0xee   : > { %v2221_v34 = vpop.permute.xlu2 %350  ;;  %v2223_v35 = vpop.permute.xlu0 %511  ;;  %v2280_v32 = vpack.c.b16 %v329_v25, %v328_v22  ;;  %v1588_v22 = vld [vmem:[%s2835_s1] sm:$0xf]  ;;  %v1628_v25 = vld [vmem:[%s2835_s1 + $0x8] sm:$0xf0] }
  0xef   : > { %v2225_v37 = vpop.permute.xlu1 %403  ;;  %v529_v38 = vsel %vm521_vm6, %v2147_v0, %v2223_v35 }
  0xf0   : > { %843 = vmatpush.bf16.msrb.mxu2 %v529_v38  ;;  %v423_v39 = vsel %vm415_vm7, %v2225_v37, %v2164_v11 }
  0xf1   : > { %825 = vmatpush.bf16.msra.mxu3 %v423_v39 }
  0xf4   : > { %499 = vrot.lane.b32.xlu2 %v2005_v60, %s1829_s9  ;;  %395 = vrot.lane.b32.xlu0 %v2133_v56, %s1830_s10 }
  0xf5   : > { %397 = vrot.lane.b32.xlu1 %v2154_v10, %s1830_s10 }
  0xf6   : > { %v494_v49 = vpop.permute.xlu2 %493  ;;  %v2239_v51 = vpop.permute.xlu0 %446 }
  0xf7   : > { %v547_v55 = vpop.permute.xlu1 %546  ;;  %v522_v33 = vsel %vm521_vm6, %v494_v49, %v2180_v16  ;;  %v471_v46 = vsel %vm468_vm3, %v2127_v50, %v2239_v51  ;;  %v1627_v50 = vld [vmem:[%s2835_s1 + $0x4] sm:$0xf] }
  0xf8   : > { %v575_v58 = vsel %vm574_vm4, %v547_v55, %v2111_v36 }
  0xf9   : > { %800 = vmatpush.bf16.msra.mxu1 %v575_v58  ;;  %v2323_v58 = vor.u32 %v1627_v50, %v1590_v48 }
  0xfc   : > { %466 = vrot.lane.b32.xlu2 %v2243_v59, %s1827_s7  ;;  %727 = vrot.lane.b32.xlu0 %v2117_v41, %s1826_s5 }
  0xfd   : > { %334 = vrot.lane.b32.xlu1 %v1985_v57, %s1831_s11 }
  0xfe   : > { %v2253_v5 = vpop.permute.xlu2 %338  ;;  %v2255_v12 = vpop.permute.xlu0 %497 }
  0xff   : > { %v2257_v36 = vpop.permute.xlu1 %389  ;;  %v523_v13 = vsel %vm521_vm6, %v2180_v16, %v2255_v12 }
 0x100   : > { %844 = vmatpush.bf16.msrb.mxu2 %v523_v13  ;;  %v417_v14 = vsel %vm415_vm7, %v2257_v36, %v2198_v23 }
 0x101   : > { %826 = vmatpush.bf16.msra.mxu3 %v417_v14 }
 0x103   : > { %845 = vmatmul.bf16.vlgmr.msrb.gmra.mxu2 %v2323_v58 }
 0x104   : > { %358 = vrot.lane.b32.xlu2 %v2115_v40, %s1831_s11  ;;  %568 = vrot.lane.b32.xlu0 %v2117_v41, %s1828_s8 }
 0x105   : > { %356 = vrot.lane.b32.xlu1 %v2117_v41, %s1831_s11 }
 0x106   : > { %v2271_v26 = vpop.permute.xlu2 %723  ;;  %v2273_v27 = vpop.permute.xlu0 %407 }
 0x107   : > { %v741_v29 = vsel %vm733_vm1, %v2059_v2, %v2271_v26  ;;  %v508_v30 = vpop.permute.xlu1 %507  ;;  %v477_v2 = vsel %vm468_vm3, %v2166_v1, %v2200_v24 }
 0x108   : > { %v528_v31 = vsel %vm521_vm6, %v508_v30, %v2147_v0  ;;  %857 = vmatpush.bf16.msra.mxu2 %v741_v29  ;;  %v2395_v29 = vor.u32 %v1628_v25, %v1588_v22 }
 0x109   : > { %801 = vmatpush.bf16.msra.mxu1 %v528_v31 }
 0x10c   : > { %554 = vrot.lane.b32.xlu2 %v2133_v56, %s1828_s8  ;;  %713 = vrot.lane.b32.xlu0 %v2133_v56, %s1826_s5 }
 0x10d   : > { %452 = vrot.lane.b32.xlu1 %v2280_v32, %s1827_s7  ;;  %802 = vmatpush.bf16.msra.mxu1 %v522_v33 }
 0x10e   : > { %v455_v0 = vpop.permute.xlu2 %454  ;;  %v353_v38 = vpop.permute.xlu0 %352 }
 0x10f   : > { %v2293_v39 = vpop.permute.xlu1 %393  ;;  %v475_v44 = vsel %vm468_vm3, %v455_v0, %v2097_v19  ;;  %v370_v16 = vsel %vm362_vm8, %v2221_v34, %v353_v38  ;;  %v424_v19 = vsel %vm415_vm7, %v2164_v11, %v2273_v27 }
 0x110   : > { %781 = vmatpush.bf16.msra.mxu0 %v475_v44  ;;  %827 = vmatpush.bf16.msra.mxu3 %v370_v16  ;;  %v418_v61 = vsel %vm415_vm7, %v2198_v23, %v2293_v39 }
 0x111   : > { %865 = vmatpush.bf16.msrb.mxu1 %v477_v2 }
 0x112   : > { %803 = vmatmul.bf16.vlgmr.msra.gmra.mxu1 %v2323_v58 }
 0x114   : > { %676 = vrot.lane.b32.xlu2 %v2115_v40, %s1824_s22  ;;  %342 = vrot.lane.b32.xlu0 %v2133_v56, %s1831_s11 }
 0x115   : > { %866 = vmatpush.bf16.msrb.mxu1 %v471_v46  ;;  %344 = vrot.lane.b32.xlu1 %v2154_v10, %s1831_s11 }
 0x116   : > { %v441_v1 = vpop.permute.xlu2 %440  ;;  %v2311_v47 = vpop.permute.xlu0 %672 }
 0x117   : > { %v2319_v49 = vpop.permute.xlu1 %336  ;;  %v469_v55 = vsel %vm468_vm3, %v441_v1, %v2184_v20  ;;  %v689_v8 = vsel %vm680_vm0, %v2081_v7, %v2311_v47 }
 0x118   : > { %782 = vmatpush.bf16.msra.mxu0 %v469_v55  ;;  %v364_v11 = vsel %vm362_vm8, %v2319_v49, %v2253_v5 }
 0x119   : > { %867 = vmatpush.bf16.msrb.mxu1 %v424_v19  ;;  %828 = vmatpush.bf16.msra.mxu3 %v364_v11 }
 0x11c   : > { %515 = vrot.lane.b32.xlu2 %v2117_v41, %s1829_s9  ;;  %678 = vrot.lane.b32.xlu0 %v2243_v59, %s1824_s22 }
 0x11d   : > { %868 = vmatpush.bf16.msrb.mxu1 %v418_v61  ;;  %413 = vrot.lane.b32.xlu1 %v2243_v59, %s1830_s10 }
 0x11e   : > { %829 = vmatpush.bf16.msra.mxu3 %v1957_v42  ;;  %v2340_v20 = vpop.permute.xlu2 %464  ;;  %v2342_v62 = vpop.permute.xlu0 %354 }
 0x11f   : > { %v2344_v23 = vpop.permute.xlu1 %658  ;;  %v371_v3 = vsel %vm362_vm8, %v353_v38, %v2342_v62 }
 0x120   : > { %v683_v42 = vsel %vm680_vm0, %v2083_v9, %v2344_v23 }
 0x121   : > { %869 = vmatpush.bf16.msrb.mxu1 %v371_v3 }
 0x122   : > { %830 = vmatpush.bf16.msra.mxu3 %v1961_v45 }
 0x124   : > { %399 = vrot.lane.b32.xlu2 %v2280_v32, %s1830_s10  ;;  %662 = vrot.lane.b32.xlu0 %v2154_v10, %s1824_s22 }
 0x125   : > { %664 = vrot.lane.b32.xlu1 %v2280_v32, %s1824_s22  ;;  %831 = vmatmul.bf16.vlgmr.msra.gmra.mxu3 %v2395_v29 }
 0x126   : > { %879 = vmatpush.bf16.msrb.mxu3 %v689_v8  ;;  %v2361_v45 = vpop.permute.xlu2 %660  ;;  %v2363_v13 = vpop.permute.xlu0 %340 }
 0x127   : > { %v2365_v7 = vpop.permute.xlu1 %619  ;;  %v365_v14 = vsel %vm362_vm8, %v2253_v5, %v2363_v13  ;;  %v684_v19 = vsel %vm680_vm0, %v2344_v23, %v2361_v45 }
 0x128   : > { %870 = vmatpush.bf16.msrb.mxu1 %v365_v14  ;;  %v636_v15 = vsel %vm627_vm2, %v2095_v18, %v2365_v7 }
 0x12a   : > { %880 = vmatpush.bf16.msrb.mxu3 %v683_v42 }
 0x12c   : > { %625 = vrot.lane.b32.xlu2 %v2243_v59, %s1825_s4  ;;  %501 = vrot.lane.b32.xlu0 %v2133_v56, %s1829_s9 }
 0x12d   : > { %623 = vrot.lane.b32.xlu1 %v2115_v40, %s1825_s4  ;;  %871 = vmatpush.bf16.msrb.mxu1 %v1969_v53 }
 0x12e   : > { %881 = vmatpush.bf16.msrb.mxu3 %v636_v15  ;;  %v2380_v9 = vpop.permute.xlu2 %552  ;;  %v710_v5 = vpop.permute.xlu0 %709 }
 0x12f   : > { %v2382_v21 = vpop.permute.xlu1 %605  ;;  %v735_v18 = vsel %vm733_vm1, %v2129_v52, %v710_v5  ;;  %v577_v38 = vsel %vm574_vm4, %v2182_v17, %v2380_v9 }
 0x130   : > { %858 = vmatpush.bf16.msra.mxu2 %v735_v18  ;;  %v630_v53 = vsel %vm627_vm2, %v2069_v4, %v2382_v21 }
 0x131   : > { %872 = vmatpush.bf16.msrb.mxu1 %v1971_v54 }
 0x132   : > { %882 = vmatpush.bf16.msrb.mxu3 %v630_v53 }
 0x133   : > { %1599 = vmatmul.msk.bf16.vlgmr.msra.gmra.mxu2 %vm777_vm5, %v2208_v28 }
 0x134   : > { %609 = vrot.lane.b32.xlu2 %v2154_v10, %s1825_s4  ;;  %729 = vrot.lane.b32.xlu0 %v2115_v40, %s1826_s5 }
 0x135   : > { %360 = vrot.lane.b32.xlu1 %v2243_v59, %s1831_s11  ;;  %873 = vmatmul.bf16.vlgmr.msrb.gmra.mxu1 %v2395_v29 }
 0x136   : > { %v2408_v4 = vpop.permute.xlu2 %725  ;;  %v2410_v52 = vpop.permute.xlu0 %674 }
 0x137   : > { %v742_v54 = vsel %vm733_vm1, %v2271_v26, %v2408_v4  ;;  %v2415_v30 = vpop.permute.xlu1 %462  ;;  %v690_v46 = vsel %vm680_vm0, %v2311_v47, %v2410_v52 }
 0x138   : > { %899 = vmatpush.bf16.msrb.mxu2 %v742_v54  ;;  %v479_v55 = vsel %vm468_vm3, %v2415_v30, %v2340_v20 }
 0x13c   : > { %346 = vrot.lane.b32.xlu2 %v2280_v32, %s1831_s11  ;;  %611 = vrot.lane.b32.xlu0 %v2280_v32, %s1825_s4  ;;  %s1774_s4 = scalar_lea.hbm %s2837_s3, 384 }
 0x13d   : > { %715 = vrot.lane.b32.xlu1 %v2154_v10, %s1826_s5 }
 0x13e   : > { %v2423_v31 = vpop.permute.xlu2 %513  ;;  %v2425_v33 = vpop.permute.xlu0 %566 }
 0x13f   : > { %v402_v2 = vpop.permute.xlu1 %401  ;;  %v583_v26 = vsel %vm574_vm4, %v2149_v6, %v2425_v33  ;;  %v530_v17 = vsel %vm521_vm6, %v2223_v35, %v2423_v31 }
 0x140   : > { %v422_v0 = vsel %vm415_vm7, %v402_v2, %v2225_v37  ;;  %883 = vmatpush.bf16.msrb.mxu3 %v583_v26 }
 0x141   : > { %783 = vmatpush.bf16.msra.mxu0 %v422_v0 }
 0x144   : > { %556 = vrot.lane.b32.xlu2 %v2154_v10, %s1828_s8  ;;  %570 = vrot.lane.b32.xlu0 %v2115_v40, %s1828_s8 }
 0x145   : > { %572 = vrot.lane.b32.xlu1 %v2243_v59, %s1828_s8  ;;  %884 = vmatpush.bf16.msrb.mxu3 %v577_v38 }
 0x146   : > { %v2441_v6 = vpop.permute.xlu2 %711  ;;  %v2443_v44 = vpop.permute.xlu0 %448 }
 0x147   : > { %v2445_v37 = vpop.permute.xlu1 %450  ;;  %v736_v16 = vsel %vm733_vm1, %v710_v5, %v2441_v6 }
 0x148   : > { %900 = vmatpush.bf16.msrb.mxu2 %v736_v16 }
 0x149   : > { %885 = vmatpush.bf16.msrb.mxu3 %v530_v17 }
 0x14b   : > { %1600 = vmatmul.msk.bf16.vlgmr.msrb.gmra.mxu2 %vm777_vm5, %v2208_v28 }
 0x14c   : > { %921 = vmatpush.bf16.msra.mxu2 %v690_v46  ;;  %517 = vrot.lane.b32.xlu2 %v2115_v40, %s1829_s9 }
 0x14d   : > { %558 = vrot.lane.b32.xlu0 %v2280_v32, %s1828_s8  ;;  %731 = vrot.lane.b32.xlu1 %v2243_v59, %s1826_s5 }
 0x14e   : > { %v2466_v35 = vpop.permute.xlu2 %499  ;;  %v388_v1 = vpop.permute.xlu0 %387 }
 0x14f   : > { %v2468_v47 = vpop.permute.xlu1 %621  ;;  %v416_v50 = vsel %vm415_vm7, %v388_v1, %v2257_v36  ;;  %v524_v48 = vsel %vm521_vm6, %v2255_v12, %v2466_v35  ;;  %v473_v12 = vsel %vm468_vm3, %v2443_v44, %v2445_v37 }
 0x150   : > { %922 = vmatpush.bf16.msra.mxu2 %v684_v19  ;;  %784 = vmatpush.bf16.msra.mxu0 %v416_v50  ;;  %v637_v11 = vsel %vm627_vm2, %v2365_v7, %v2468_v47 }
 0x151   : > { %886 = vmatpush.bf16.msrb.mxu3 %v524_v48 }
 0x154   : > { %923 = vmatpush.bf16.msra.mxu2 %v637_v11  ;;  %887 = vmatmul.bf16.vlgmr.msrb.gmra.mxu3 %v2323_v58 }
 0x155   : > { %949 = vmatpush.bf16.msra.mxu3 %v479_v55  ;;  %503 = vrot.lane.b32.xlu2 %v2154_v10, %s1829_s9 }
 0x156   : > { %519 = vrot.lane.b32.xlu0 %v2243_v59, %s1829_s9  ;;  %717 = vrot.lane.b32.xlu1 %v2280_v32, %s1826_s5  ;;  %v467_v36 = vpop.permute.xlu2 %466  ;;  %v410_v61 = vpop.permute.xlu0 %409 }
 0x157   : > { %v2493_v23 = vsel %vm468_vm3, %v2340_v20, %v467_v36  ;;  %v2495_v3 = vpop.permute.xlu1 %411 }
 0x158   : > { %v426_v8 = vsel %vm415_vm7, %v410_v61, %v2495_v3 }
 0x159   : > { %950 = vmatpush.bf16.msra.mxu3 %v473_v12 }
 0x15d   : > { %951 = vmatpush.bf16.msra.mxu3 %v426_v8 }
 0x15e   : > { %505 = vrot.lane.b32.xlu0 %v2280_v32, %s1829_s9  ;;  %v2501_v59 = vpop.permute.xlu2 %358  ;;  %v349_v42 = vpop.permute.xlu0 %348 }
 0x15f   : > { %v2503_v7 = vpop.permute.xlu1 %607  ;;  %v369_v14 = vsel %vm362_vm8, %v349_v42, %v2221_v34 }
 0x160   : > { %785 = vmatpush.bf16.msra.mxu0 %v369_v14  ;;  %v631_v20 = vsel %vm627_vm2, %v2382_v21, %v2503_v7 }
 0x161   : > { %924 = vmatpush.bf16.msra.mxu2 %v631_v20 }
 0x166   : > { %v2510_v15 = vpop.permute.xlu2 %554  ;;  %v396_v5 = vpop.permute.xlu0 %395 }
 0x167   : > { %v2512_v18 = vpop.permute.xlu1 %397 }
 0x168   : > { %v420_v32 = vsel %vm415_vm7, %v396_v5, %v2512_v18 }
 0x169   : > { %952 = vmatpush.bf16.msra.mxu3 %v420_v32 }
 0x16e   : > { %v2516_v22 = vpop.permute.xlu0 %727  ;;  %v2518_v25 = vpop.permute.xlu2 %676 }
 0x16f   : > { %v335_v34 = vpop.permute.xlu1 %334  ;;  %v743_v53 = vsel %vm733_vm1, %v2408_v4, %v2516_v22  ;;  %v472_v4 = vsel %vm468_vm3, %v2239_v51, %v2443_v44  ;;  %v419_v51 = vsel %vm415_vm7, %v2293_v39, %v396_v5  ;;  %v691_v39 = vsel %vm680_vm0, %v2410_v52, %v2518_v25 }
 0x170   : > { %v363_v21 = vsel %vm362_vm8, %v335_v34, %v2319_v49  ;;  %941 = vmatpush.bf16.msra.mxu1 %v743_v53  ;;  %v478_v49 = vsel %vm468_vm3, %v2200_v24, %v2415_v30 }
 0x171   : > { %786 = vmatpush.bf16.msra.mxu0 %v363_v21 }
 0x175   : > { %787 = vmatpush.bf16.msra.mxu0 %v1959_v43  ;;  %v578_v43 = vsel %vm574_vm4, %v2380_v9, %v2510_v15  ;;  %v425_v9 = vsel %vm415_vm7, %v2273_v27, %v410_v61 }
 0x176   : > { %v2526_v54 = vpop.permute.xlu0 %568  ;;  %v2533_v38 = vpop.permute.xlu2 %515 }
 0x177   : > { %v357_v2 = vpop.permute.xlu1 %356  ;;  %v584_v26 = vsel %vm574_vm4, %v2425_v33, %v2526_v54  ;;  %v531_v24 = vsel %vm521_vm6, %v2423_v31, %v2533_v38 }
 0x178   : > { %925 = vmatpush.bf16.msra.mxu2 %v584_v26  ;;  %v373_v0 = vsel %vm362_vm8, %v357_v2, %v2501_v59 }
 0x179   : > { %788 = vmatpush.bf16.msra.mxu0 %v1985_v57  ;;  %953 = vmatpush.bf16.msra.mxu3 %v373_v0 }
 0x17c   : > { %789 = vmatmul.bf16.vlgmr.msra.gmra.mxu0 %v2395_v29  ;;  %926 = vmatpush.bf16.msra.mxu2 %v578_v43 }
 0x17d   : > { %907 = vmatpush.bf16.msrb.mxu0 %v478_v49 }
 0x17e   : > { %v714_v33 = vpop.permute.xlu0 %713  ;;  %v400_v16 = vpop.permute.xlu2 %399 }
 0x17f   : > { %v453_v57 = vpop.permute.xlu1 %452  ;;  %v737_v30 = vsel %vm733_vm1, %v2441_v6, %v714_v33  ;;  %v372_v6 = vsel %vm362_vm8, %v2342_v62, %v357_v2  ;;  %v421_v61 = vsel %vm415_vm7, %v2512_v18, %v400_v16  ;;  %v2598_v18 = vpop.f32.mrf.mxu2 }
 0x180   : > { %927 = vmatpush.bf16.msra.mxu2 %v531_v24  ;;  %942 = vmatpush.bf16.msra.mxu1 %v737_v30 }
 0x181   : > { %908 = vmatpush.bf16.msrb.mxu0 %v472_v4 }
 0x183   : > { %1601 = vmatmul.msk.bf16.vlgmr.msra.gmra.mxu1 %vm777_vm5, %v2208_v28 }
 0x185   : > { %909 = vmatpush.bf16.msrb.mxu0 %v425_v9 }
 0x186   : > { %v343_v44 = vpop.permute.xlu0 %342  ;;  %v626_v17 = vpop.permute.xlu2 %625 }
 0x187   : > { %v345_v46 = vpop.permute.xlu1 %344  ;;  %v366_v27 = vsel %vm362_vm8, %v2363_v13, %v343_v44 }
 0x188   : > { %v367_v31 = vsel %vm362_vm8, %v343_v44, %v345_v46 }
 0x189   : > { %910 = vmatpush.bf16.msrb.mxu0 %v419_v51  ;;  %954 = vmatpush.bf16.msra.mxu3 %v367_v31 }
 0x18d   : > { %911 = vmatpush.bf16.msrb.mxu0 %v372_v6  ;;  %955 = vmatpush.bf16.msra.mxu3 %v2117_v41 }
 0x18e   : > { %v679_v19 = vpop.permute.xlu0 %678  ;;  %v610_v50 = vpop.permute.xlu2 %609 }
 0x18f   : > { %v414_v1 = vpop.permute.xlu1 %413  ;;  %v632_v55 = vsel %vm627_vm2, %v2503_v7, %v610_v50  ;;  %v692_v7 = vsel %vm680_vm0, %v2518_v25, %v679_v19  ;;  %v804_v30 = vpop.f32.mrf.mxu1 }
 0x191   : > { %912 = vmatpush.bf16.msrb.mxu0 %v366_v27  ;;  %956 = vmatpush.bf16.msra.mxu3 %v2133_v56 }
 0x194   : > { %957 = vmatmul.bf16.vlgmr.msra.gmra.mxu3 %v2395_v29 }
 0x195   : > { %913 = vmatpush.bf16.msrb.mxu0 %v2019_v63 }
 0x196   : > { %v663_v62 = vpop.permute.xlu0 %662 }
 0x197   : > { %v665_v13 = vpop.permute.xlu1 %664  ;;  %v685_v41 = vsel %vm680_vm0, %v2361_v45, %v663_v62  ;;  %v474_v45 = vsel %vm468_vm3, %v2445_v37, %v453_v57 }
 0x198   : > { %v686_v20 = vsel %vm680_vm0, %v663_v62, %v665_v13 }
 0x199   : > { %914 = vmatpush.bf16.msrb.mxu0 %v2005_v60  ;;  %v347_v60 = vpop.permute.xlu2 %346 }
 0x19c   : > { %915 = vmatmul.bf16.vlgmr.msrb.gmra.mxu0 %v2395_v29 }
 0x19d   : > { %963 = vmatpush.bf16.msra.mxu0 %v691_v39 }
 0x19e   : > { %v502_v56 = vpop.permute.xlu0 %501 }
 0x19f   : > { %v624_v63 = vpop.permute.xlu1 %623  ;;  %v525_v48 = vsel %vm521_vm6, %v2466_v35, %v502_v56 }
 0x1a0   : > { %928 = vmatpush.bf16.msra.mxu2 %v525_v48  ;;  %v638_v52 = vsel %vm627_vm2, %v2468_v47, %v624_v63  ;;  %v427_v47 = vsel %vm415_vm7, %v2495_v3, %v414_v1  ;;  %v368_v3 = vsel %vm362_vm8, %v345_v46, %v347_v60  ;;  %v806_v46 = vpop.f32.mrf.mxu1 }
 0x1a1   : > { %964 = vmatpush.bf16.msra.mxu0 %v685_v41  ;;  %v557_v36 = vpop.permute.xlu2 %556 }
 0x1a2   : > { %v579_v25 = vsel %vm574_vm4, %v2510_v15, %v557_v36 }
 0x1a3   : > { %929 = vmatmul.bf16.vlgmr.msra.gmra.mxu2 %v2323_v58 }
 0x1a4   : > { %991 = vmatpush.bf16.msrb.mxu2 %v2493_v23 }
 0x1a5   : > { %965 = vmatpush.bf16.msra.mxu0 %v638_v52 }
 0x1a6   : > { %v730_v11 = vpop.permute.xlu0 %729 }
 0x1a7   : > { %v361_v35 = vpop.permute.xlu1 %360  ;;  %v744_v12 = vsel %vm733_vm1, %v2516_v22, %v730_v11  ;;  %v639_v22 = vsel %vm627_vm2, %v624_v63, %v626_v17 }
 0x1a8   : > { %992 = vmatpush.bf16.msrb.mxu2 %v474_v45  ;;  %983 = vmatpush.bf16.msrb.mxu1 %v744_v12  ;;  %v374_v42 = vsel %vm362_vm8, %v2501_v59, %v361_v35  ;;  %v832_v9 = vpop.f32.mrf.mxu3 }
 0x1a9   : > { %966 = vmatpush.bf16.msra.mxu0 %v632_v55  ;;  %v518_v14 = vpop.permute.xlu2 %517 }
 0x1ac   : > { %993 = vmatpush.bf16.msrb.mxu2 %v427_v47  ;;  %v1631_v47 = vld [vmem:[%s2836_s2 + $0x8] sm:$0xff] }
 0x1ae   : > { %v612_v23 = vpop.permute.xlu0 %611 }
 0x1af   : > { %v716_v8 = vpop.permute.xlu1 %715  ;;  %v633_v34 = vsel %vm627_vm2, %v610_v50, %v612_v23 }
 0x1b0   : > { %994 = vmatpush.bf16.msrb.mxu2 %v421_v61  ;;  %v738_v37 = vsel %vm733_vm1, %v714_v33, %v716_v8  ;;  %v834_v31 = vpop.f32.mrf.mxu3 }
 0x1b1   : > { %984 = vmatpush.bf16.msrb.mxu1 %v738_v37  ;;  %v504_v2 = vpop.permute.xlu2 %503 }
 0x1b2   : > { %v526_v0 = vsel %vm521_vm6, %v502_v56, %v504_v2  ;;  %v874_v39 = vpop.f32.mrf.mxu1 }
 0x1b4   : > { %995 = vmatpush.bf16.msrb.mxu2 %v374_v42  ;;  %1602 = vmatmul.msk.bf16.vlgmr.msrb.gmra.mxu1 %vm777_vm5, %v2208_v28 }
 0x1b5   : > { %1005 = vmatpush.bf16.msra.mxu1 %v692_v7 }
 0x1b6   : > { %v571_v5 = vpop.permute.xlu0 %570 }
 0x1b7   : > { %v573_v59 = vpop.permute.xlu1 %572  ;;  %v585_v32 = vsel %vm574_vm4, %v2526_v54, %v571_v5  ;;  %v532_v54 = vsel %vm521_vm6, %v2533_v38, %v518_v14 }
 0x1b8   : > { %996 = vmatpush.bf16.msrb.mxu2 %v368_v3  ;;  %967 = vmatpush.bf16.msra.mxu0 %v585_v32  ;;  %v586_v15 = vsel %vm574_vm4, %v571_v5, %v573_v59 }
 0x1b9   : > { %1006 = vmatpush.bf16.msra.mxu1 %v686_v20 }
 0x1ba   : > { %v876_v56 = vpop.f32.mrf.mxu1 }
 0x1bc   : > { %997 = vmatpush.bf16.msrb.mxu2 %v2115_v40  ;;  %968 = vmatpush.bf16.msra.mxu0 %v579_v25  ;;  %v820_v40 = vpop.f32.mrf.mxu2 }
 0x1bd   : > { %1007 = vmatpush.bf16.msra.mxu1 %v639_v22 }
 0x1bf   : > { %v559_v53 = vpop.permute.xlu0 %558  ;;  %v732_v21 = vpop.permute.xlu1 %731 }
 0x1c0   : > { %998 = vmatpush.bf16.msrb.mxu2 %v2154_v10  ;;  %v745_v26 = vsel %vm733_vm1, %v730_v11, %v732_v21  ;;  %969 = vmatpush.bf16.msra.mxu0 %v532_v54  ;;  %v580_v10 = vsel %vm574_vm4, %v557_v36, %v559_v53 }
 0x1c1   : > { %1008 = vmatpush.bf16.msra.mxu1 %v633_v34  ;;  %1025 = vmatpush.bf16.msrb.mxu3 %v745_v26 }
 0x1c3   : > { %999 = vmatmul.bf16.vlgmr.msrb.gmra.mxu2 %v2395_v29 }
 0x1c4   : > { %970 = vmatpush.bf16.msra.mxu0 %v526_v0  ;;  %v846_v29 = vpop.f32.mrf.mxu2 }
 0x1c5   : > { %1009 = vmatpush.bf16.msra.mxu1 %v586_v15  ;;  %v847_v51 = vadd.f32 %v846_v29, %v832_v9 }
 0x1c7   : > { %971 = vmatmul.bf16.vlgmr.msra.gmra.mxu0 %v2323_v58 }
 0x1c8   : > { %v520_v49 = vpop.permute.xlu0 %519  ;;  %v718_v43 = vpop.permute.xlu1 %717 }
 0x1c9   : > { %1010 = vmatpush.bf16.msra.mxu1 %v580_v10  ;;  %v533_v38 = vsel %vm521_vm6, %v518_v14, %v520_v49  ;;  %v739_v4 = vsel %vm733_vm1, %v716_v8, %v718_v43 }
 0x1ca   : > { %1026 = vmatpush.bf16.msrb.mxu3 %v739_v4 }
 0x1cc   : > { %v848_v24 = vpop.f32.mrf.mxu2 }
 0x1cd   : > { %1011 = vmatpush.bf16.msra.mxu1 %v533_v38  ;;  %1603 = vmatmul.msk.bf16.vlgmr.msrb.gmra.mxu3 %vm777_vm5, %v2208_v28  ;;  %v849_v6 = vadd.f32 %v848_v24, %v834_v31 }
 0x1d0   : > { %v506_v33 = vpop.permute.xlu0 %505 }
 0x1d1   : > { %v527_v57 = vsel %vm521_vm6, %v504_v2, %v506_v33 }
 0x1d2   : > { %1012 = vmatpush.bf16.msra.mxu1 %v527_v57 }
 0x1d4   : > { %v860_v16 = vpop.f32.mrf.mxu2 }
 0x1d5   : > { %1013 = vmatmul.bf16.vlgmr.msra.gmra.mxu1 %v2323_v58  ;;  %v861_v44 = vadd.f32 %v860_v16, %v847_v51  ;;  %v2625_v58 = vld [vmem:[%s2836_s2] sm:$0xff] }
 0x1d7   : > { %v1034_v27 = vmax.f32 %v861_v44, 0.0  ;;  %v888_v62 = vpop.f32.mrf.mxu3 }
 0x1d8   : > { %v889_v13 = vadd.f32 %v888_v62, %v874_v39 }
 0x1dc   : > { %v862_v17 = vpop.f32.mrf.mxu2 }
 0x1dd   : > { %v863_v19 = vadd.f32 %v862_v17, %v849_v6 }
 0x1df   : > { %v1040_v1 = vmax.f32 %v863_v19, 0.0  ;;  %v890_v63 = vpop.f32.mrf.mxu3 }
 0x1e0   : > { %v891_v48 = vadd.f32 %v890_v63, %v876_v56 }
 0x1e1   : > { %v1046_v28 = vpack.c.bf16 %v1040_v1, %v1034_v27 }
 0x1e3   : > { %1098 = vmatpush.bf16.msra.mxu3 %v1046_v28 }
 0x1e4   : > { %v902_v50 = vpop.f32.mrf.mxu2 }
 0x1e5   : > { %v903_v41 = vadd.f32 %v902_v50, %v889_v13 }
 0x1e6   : > { %1614 = vmatmul.msk.bf16.vlgmr.msra.gmra.mxu3 %vm1065_vm9, %v2625_v58 }
 0x1e7   : > { %v1035_v60 = vmax.f32 %v903_v41, 0.0 }
 0x1ec   : > { %v904_v52 = vpop.f32.mrf.mxu2 }
 0x1ed   : > { %v905_v55 = vadd.f32 %v904_v52, %v891_v48 }
 0x1ef   : > { %v1041_v11 = vmax.f32 %v905_v55, 0.0 }
 0x1f1   : > { %v1047_v35 = vpack.c.bf16 %v1041_v11, %v1035_v60 }
 0x1f3   : > { %1117 = vmatpush.bf16.msra.mxu2 %v1047_v35 }
 0x1f6   : > { %1616 = vmatmul.msk.bf16.vlgmr.msra.gmra.mxu2 %vm1065_vm9, %v2625_v58  ;;  %1615 = vmatmul.msk.bf16.gmra.mxu3 %vm1065_vm9, %v1631_v47 }
 0x1f9   : > { %v790_v45 = vpop.f32.mrf.mxu0 }
 0x1fa   : > { %v805_v12 = vadd.f32 %v804_v30, %v790_v45 }
 0x1fc   : > { %v819_v61 = vadd.f32 %v2598_v18, %v805_v12 }
 0x1fe   : > { %v1033_v37 = vmax.f32 %v819_v61, 0.0 }
 0x200   : > { %v944_v14 = vpop.f32.mrf.mxu1 }
 0x201   : > { %v792_v36 = vpop.f32.mrf.mxu0 }
 0x202   : > { %v807_v23 = vadd.f32 %v806_v46, %v792_v36 }
 0x204   : > { %v821_v8 = vadd.f32 %v820_v40, %v807_v23 }
 0x206   : > { %v1039_v42 = vmax.f32 %v821_v8, 0.0  ;;  %1617 = vmatmul.msk.bf16.gmra.mxu2 %vm1065_vm9, %v1631_v47 }
 0x208   : > { %v1045_v7 = vpack.c.bf16 %v1039_v42, %v1033_v37  ;;  %v946_v22 = vpop.f32.mrf.mxu1 }
 0x20a   : > { %1079 = vmatpush.bf16.msrb.mxu0 %v1045_v7  ;;  %v1696_v7 = vld [vmem:[%s1935_s6] sm:$0xff] }
 0x20d   : > { %1612 = vmatmul.msk.bf16.vlgmr.msrb.gmra.mxu0 %vm1065_vm9, %v2625_v58 }
 0x217   : > { %v958_v26 = vpop.f32.mrf.mxu3 }
 0x219   : > { %v916_v3 = vpop.f32.mrf.mxu0 }
 0x21d   : > { %1613 = vmatmul.msk.bf16.gmra.mxu0 %vm1065_vm9, %v1631_v47 }
 0x21f   : > { %v960_v0 = vpop.f32.mrf.mxu3 }
 0x221   : > { %v918_v59 = vpop.f32.mrf.mxu0 }
 0x226   : > { %v930_v20 = vpop.f32.mrf.mxu2 }
 0x227   : > { %v931_v5 = vadd.f32 %v930_v20, %v916_v3 }
 0x229   : > { %v945_v32 = vadd.f32 %v944_v14, %v931_v5 }
 0x22b   : > { %v1036_v34 = vmax.f32 %v945_v32, 0.0 }
 0x22e   : > { %v932_v18 = vpop.f32.mrf.mxu2 }
 0x22f   : > { %v933_v25 = vadd.f32 %v932_v18, %v918_v59  ;;  %v1697_v59 = vld [vmem:[%s1935_s6 + $0x38] sm:$0xff] }
 0x231   : > { %v947_v53 = vadd.f32 %v946_v22, %v933_v25  ;;  %v986_v2 = vpop.f32.mrf.mxu1  ;;  %v1698_v22 = vld [vmem:[%s1935_s6 + $0x8] sm:$0xff] }
 0x233   : > { %v1042_v21 = vmax.f32 %v947_v53, 0.0 }
 0x235   : > { %v1048_v54 = vpack.c.bf16 %v1042_v21, %v1036_v34  ;;  %v1699_v21 = vld [vmem:[%s1935_s6 + $0x70] sm:$0xff] }
 0x237   : > { %1136 = vmatpush.bf16.msrb.mxu1 %v1048_v54 }
 0x239   : > { %v988_v15 = vpop.f32.mrf.mxu1 }
 0x23a   : > { %1618 = vmatmul.msk.bf16.vlgmr.msrb.gmra.mxu1 %vm1065_vm9, %v2625_v58 }
 0x244   : > { %v972_v40 = vpop.f32.mrf.mxu0 }
 0x245   : > { %v973_v10 = vadd.f32 %v972_v40, %v958_v26  ;;  %v1700_v26 = vld [vmem:[%s1935_s6 + $0x40] sm:$0xff] }
 0x246   : > { %v1000_v4 = vpop.f32.mrf.mxu2 }
 0x247   : > { %v987_v43 = vadd.f32 %v986_v2, %v973_v10 }
 0x249   : > { %v1037_v24 = vmax.f32 %v987_v43, 0.0 }
 0x24a   : > { %1619 = vmatmul.msk.bf16.gmra.mxu1 %vm1065_vm9, %v1631_v47 }
 0x24c   : > { %v974_v49 = vpop.f32.mrf.mxu0 }
 0x24d   : > { %v975_v38 = vadd.f32 %v974_v49, %v960_v0  ;;  %v1701_v49 = vld [vmem:[%s1935_s6 + $0xa8] sm:$0xff] }
 0x24e   : > { %v1002_v51 = vpop.f32.mrf.mxu2 }
 0x24f   : > { %v989_v29 = vadd.f32 %v988_v15, %v975_v38 }
 0x250   : > { %v1028_v33 = vpop.f32.mrf.mxu3 }
 0x251   : > { %v1043_v30 = vmax.f32 %v989_v29, 0.0  ;;  %v1702_v29 = vld [vmem:[%s1935_s6 + $0x10] sm:$0xff] }
 0x252   : > { %v1014_v57 = vpop.f32.mrf.mxu1 }
 0x253   : > { %v1049_v9 = vpack.c.bf16 %v1043_v30, %v1037_v24  ;;  %v1015_v16 = vadd.f32 %v1014_v57, %v1000_v4  ;;  %v1703_v57 = vld [vmem:[%s1935_s6 + $0x78] sm:$0xff] }
 0x255   : > { %1155 = vmatpush.bf16.msra.mxu0 %v1049_v9  ;;  %v1029_v46 = vadd.f32 %v1028_v33, %v1015_v16  ;;  %v1704_v16 = vld [vmem:[%s1935_s6 + $0x48] sm:$0xff] }
 0x257   : > { %v1038_v27 = vmax.f32 %v1029_v46, 0.0 }
 0x258   : > { %1620 = vmatmul.msk.bf16.vlgmr.msra.gmra.mxu0 %vm1065_vm9, %v2625_v58  ;;  %v1030_v6 = vpop.f32.mrf.mxu3 }
 0x25a   : > { %v1016_v44 = vpop.f32.mrf.mxu1 }
 0x25b   : > { %v1017_v31 = vadd.f32 %v1016_v44, %v1002_v51 }
 0x25d   : > { %v1031_v17 = vadd.f32 %v1030_v6, %v1017_v31  ;;  %v1705_v31 = vld [vmem:[%s1935_s6 + $0x18] sm:$0xff] }
 0x25f   : > { %v1044_v19 = vmax.f32 %v1031_v17, 0.0 }
 0x261   : > { %v1050_v1 = vpack.c.bf16 %v1044_v19, %v1038_v27 }
 0x263   : > { %1174 = vmatpush.bf16.msrb.mxu3 %v1050_v1  ;;  %v1706_v1 = vld [vmem:[%s1935_s6 + $0xb0] sm:$0xff] }
 0x266   : > { %1622 = vmatmul.msk.bf16.vlgmr.msrb.gmra.mxu3 %vm1065_vm9, %v2625_v58 }
 0x268   : > { %1621 = vmatmul.msk.bf16.gmra.mxu0 %vm1065_vm9, %v1631_v47 }
 0x269   : > { %v1100_v28 = vpop.f32.mrf.mxu3 }
 0x26a   : > { %1212 = vrot.lane.b32.xlu2 %v1100_v28, %s1832_s19 }
 0x271   : > { %v1102_v50 = vpop.f32.mrf.mxu3 }
 0x272   : > { %1224 = vrot.lane.b32.xlu2 %v1102_v50, %s1832_s19 }
 0x276   : > { %1623 = vmatmul.msk.bf16.gmra.mxu3 %vm1065_vm9, %v1631_v47 }
 0x279   : > { %v1119_v39 = vpop.f32.mrf.mxu2  ;;  %v1105_v41 = vpop.f32.mrf.mxu3 }
 0x27a   : > { %1214 = vrot.lane.b32.xlu0 %v1119_v39, %s1832_s19  ;;  %1236 = vrot.lane.b32.xlu2 %v1105_v41, %s1832_s19  ;;  %v1707_v41 = vld [vmem:[%s1935_s6 + $0x20] sm:$0xff] }
 0x281   : > { %v1121_v13 = vpop.f32.mrf.mxu2  ;;  %v1107_v12 = vpop.f32.mrf.mxu3 }
 0x282   : > { %1226 = vrot.lane.b32.xlu0 %v1121_v13, %s1832_s19 }
 0x289   : > { %v1124_v56 = vpop.f32.mrf.mxu2 }
 0x28a   : > { %v1081_v62 = vpop.f32.mrf.mxu0  ;;  %1238 = vrot.lane.b32.xlu0 %v1124_v56, %s1832_s19 }
 0x28b   : > { %1210 = vrot.lane.b32.xlu1 %v1081_v62, %s1832_s19 }
 0x291   : > { %v1126_v48 = vpop.f32.mrf.mxu2 }
 0x292   : > { %v1083_v58 = vpop.f32.mrf.mxu0  ;;  %1250 = vrot.lane.b32.xlu0 %v1126_v48, %s1832_s19 }
 0x293   : > { %1222 = vrot.lane.b32.xlu1 %v1083_v58, %s1832_s19 }
 0x29a   : > { %v1086_v63 = vpop.f32.mrf.mxu0 }
 0x29b   : > { %1234 = vrot.lane.b32.xlu1 %v1086_v63, %s1832_s19  ;;  %v1708_v63 = vld [vmem:[%s1935_s6 + $0x58] sm:$0xff] }
 0x2a2   : > { %v1088_v52 = vpop.f32.mrf.mxu0 }
 0x2a3   : > { %1246 = vrot.lane.b32.xlu1 %v1088_v52, %s1832_s19 }
 0x2b7   : > { %v1138_v60 = vpop.f32.mrf.mxu1 }
 0x2b8   : > { %1216 = vrot.lane.b32.xlu1 %v1138_v60, %s1832_s19 }
 0x2bf   : > { %v1140_v55 = vpop.f32.mrf.mxu1 }
 0x2c0   : > { %1228 = vrot.lane.b32.xlu1 %v1140_v55, %s1832_s19 }
 0x2c4   : > { %v1213_v20 = vpop.permute.xlu2 %1212 }
 0x2c7   : > { %v1143_v45 = vpop.f32.mrf.mxu1 }
 0x2c8   : > { %1240 = vrot.lane.b32.xlu1 %v1143_v45, %s1832_s19 }
 0x2cc   : > { %v1225_v34 = vpop.permute.xlu2 %1224 }
 0x2cf   : > { %v1145_v11 = vpop.f32.mrf.mxu1 }
 0x2d0   : > { %1252 = vrot.lane.b32.xlu1 %v1145_v11, %s1832_s19 }
 0x2d4   : > { %v1237_v10 = vpop.permute.xlu2 %1236 }
 0x2d5   : > { %v1157_v35 = vpop.f32.mrf.mxu0 }
 0x2d6   : > { %1218 = vrot.lane.b32.xlu2 %v1157_v35, %s1832_s19 }
 0x2dd   : > { %v1159_v47 = vpop.f32.mrf.mxu0 }
 0x2de   : > { %1248 = vrot.lane.b32.xlu2 %v1107_v12, %s1832_s19  ;;  %v1709_v12 = vld [vmem:[%s1935_s6 + $0x80] sm:$0xff] }
 0x2e5   : > { %v1162_v61 = vpop.f32.mrf.mxu0 }
 0x2e6   : > { %1230 = vrot.lane.b32.xlu2 %v1159_v47, %s1832_s19 }
 0x2e9   : > { %v1176_v36 = vpop.f32.mrf.mxu3 }
 0x2ea   : > { %1220 = vrot.lane.b32.xlu0 %v1176_v36, %s1832_s19  ;;  %v1710_v36 = vld [vmem:[%s1935_s6 + $0xb8] sm:$0xff] }
 0x2ec   : > { %v1215_v15 = vpop.permute.xlu0 %1214 }
 0x2ed   : > { %v1164_v8 = vpop.f32.mrf.mxu0  ;;  %v1260_v38 = vsel %vm1258_vm10, %v1213_v20, %v1215_v15 }
 0x2ee   : > { %1242 = vrot.lane.b32.xlu2 %v1162_v61, %s1832_s19  ;;  %v1309_v33 = vadd.f32 %v1702_v29, %v1260_v38  ;;  %v1719_v29 = vld [vmem:[%s1935_s6 + $0xa0] sm:$0xff] }
 0x2f1   : > { %v1178_v23 = vpop.f32.mrf.mxu3 }
 0x2f2   : > { %1232 = vrot.lane.b32.xlu0 %v1178_v23, %s1832_s19  ;;  %v1711_v23 = vld [vmem:[%s1935_s6 + $0x90] sm:$0xff] }
 0x2f4   : > { %v1227_v30 = vpop.permute.xlu0 %1226 }
 0x2f5   : > { %v1265_v9 = vsel %vm1258_vm10, %v1225_v34, %v1227_v30 }
 0x2f6   : > { %1254 = vrot.lane.b32.xlu2 %v1164_v8, %s1832_s19  ;;  %v1316_v51 = vadd.f32 %v1704_v16, %v1265_v9 }
 0x2f9   : > { %v1181_v37 = vpop.f32.mrf.mxu3 }
 0x2fa   : > { %1244 = vrot.lane.b32.xlu0 %v1181_v37, %s1832_s19 }
 0x2fc   : > { %v1239_v39 = vpop.permute.xlu0 %1238 }
 0x2fd   : > { %v1211_v42 = vpop.permute.xlu1 %1210  ;;  %v1270_v60 = vsel %vm1258_vm10, %v1237_v10, %v1239_v39 }
 0x2fe   : > { %v1307_v3 = vadd.f32 %v1696_v7, %v1211_v42  ;;  %v1259_v18 = vsel %vm1258_vm10, %v1211_v42, %v1213_v20  ;;  %v1323_v47 = vadd.f32 %v1709_v12, %v1270_v60  ;;  %v1712_v7 = vld [vmem:[%s1935_s6 + $0x50] sm:$0xff] }
 0x2ff   : > { %v1308_v25 = vadd.f32 %v1698_v22, %v1259_v18  ;;  %v1715_v22 = vld [vmem:[%s1935_s6 + $0x28] sm:$0xff] }
 0x300   : > { %1363 = vrot.lane.b32.xlu1 %v1307_v3, %s1829_s9 }
 0x301   : > { %v1183_v14 = vpop.f32.mrf.mxu3 }
 0x302   : > { %1256 = vrot.lane.b32.xlu0 %v1183_v14, %s1832_s19  ;;  %v1713_v14 = vld [vmem:[%s1935_s6 + $0x88] sm:$0xff] }
 0x304   : > { %v1251_v52 = vpop.permute.xlu0 %1250 }
 0x305   : > { %v1223_v5 = vpop.permute.xlu1 %1222 }
 0x306   : > { %v1314_v32 = vadd.f32 %v1697_v59, %v1223_v5  ;;  %v1264_v2 = vsel %vm1258_vm10, %v1223_v5, %v1225_v34 }
 0x307   : > { %v1315_v40 = vadd.f32 %v1700_v26, %v1264_v2  ;;  %v1716_v2 = vld [vmem:[%s1935_s6 + $0xc0] sm:$0xff] }
 0x308   : > { %1377 = vrot.lane.b32.xlu2 %v1314_v32, %s1829_s9  ;;  %v1714_v32 = vld [vmem:[%s1935_s6 + $0x30] sm:$0xff] }
 0x30d   : > { %v1235_v53 = vpop.permute.xlu1 %1234 }
 0x30e   : > { %v1321_v54 = vadd.f32 %v1699_v21, %v1235_v53  ;;  %v1269_v4 = vsel %vm1258_vm10, %v1235_v53, %v1237_v10 }
 0x30f   : > { %v1322_v24 = vadd.f32 %v1703_v57, %v1269_v4  ;;  %v1720_v57 = vld [vmem:[%s1935_s6 + $0x98] sm:$0xff] }
 0x310   : > { %1391 = vrot.lane.b32.xlu0 %v1321_v54, %s1829_s9  ;;  %1365 = vrot.lane.b32.xlu2 %v1308_v25, %s1829_s9 }
 0x315   : > { %v1247_v0 = vpop.permute.xlu1 %1246 }
 0x316   : > { %v1328_v43 = vadd.f32 %v1701_v49, %v1247_v0 }
 0x318   : > { %1379 = vrot.lane.b32.xlu0 %v1315_v40, %s1829_s9  ;;  %1405 = vrot.lane.b32.xlu1 %v1328_v43, %s1829_s9  ;;  %v1717_v40 = vld [vmem:[%s1935_s6 + $0x68] sm:$0xff]  ;;  %v1718_v43 = vld [vmem:[%s1935_s6 + $0x60] sm:$0xff] }
 0x320   : > { %1367 = vrot.lane.b32.xlu0 %v1309_v33, %s1829_s9  ;;  %1393 = vrot.lane.b32.xlu1 %v1322_v24, %s1829_s9 }
 0x328   : > { %1381 = vrot.lane.b32.xlu1 %v1316_v51, %s1829_s9 }
 0x32a   : > { %v1217_v44 = vpop.permute.xlu1 %1216 }
 0x32b   : > { %v1261_v46 = vsel %vm1258_vm10, %v1215_v15, %v1217_v44 }
 0x32c   : > { %v1310_v6 = vadd.f32 %v1705_v31, %v1261_v46  ;;  %v1721_v46 = vld [vmem:[%s1935_s6 + $0xd8] sm:$0xff] }
 0x330   : > { %v1219_v17 = vpop.permute.xlu2 %1218  ;;  %1369 = vrot.lane.b32.xlu1 %v1310_v6, %s1829_s9 }
 0x331   : > { %v1262_v50 = vsel %vm1258_vm10, %v1217_v44, %v1219_v17 }
 0x332   : > { %v1229_v62 = vpop.permute.xlu1 %1228  ;;  %v1311_v56 = vadd.f32 %v1707_v41, %v1262_v50 }
 0x333   : > { %v1266_v37 = vsel %vm1258_vm10, %v1227_v30, %v1229_v62 }
 0x334   : > { %v1317_v3 = vadd.f32 %v1712_v7, %v1266_v37 }
 0x338   : > { %v1249_v27 = vpop.permute.xlu2 %1248 }
 0x339   : > { %v1274_v19 = vsel %vm1258_vm10, %v1247_v0, %v1249_v27  ;;  %v1275_v55 = vsel %vm1258_vm10, %v1249_v27, %v1251_v52 }
 0x33a   : > { %v1329_v28 = vadd.f32 %v1706_v1, %v1274_v19  ;;  %v1241_v45 = vpop.permute.xlu1 %1240  ;;  %v1330_v61 = vadd.f32 %v1710_v36, %v1275_v55  ;;  %v1723_v19 = vld [vmem:[%s1935_s6 + $0xd0] sm:$0xff] }
 0x33b   : > { %v1271_v42 = vsel %vm1258_vm10, %v1239_v39, %v1241_v45 }
 0x33c   : > { %1407 = vrot.lane.b32.xlu2 %v1329_v28, %s1829_s9  ;;  %v1324_v20 = vadd.f32 %v1713_v14, %v1271_v42 }
 0x340   : > { %v1231_v13 = vpop.permute.xlu2 %1230 }
 0x341   : > { %v1267_v58 = vsel %vm1258_vm10, %v1229_v62, %v1231_v13 }
 0x342   : > { %v1318_v48 = vadd.f32 %v1708_v63, %v1267_v58  ;;  %v1253_v34 = vpop.permute.xlu1 %1252 }
 0x343   : > { %v1276_v21 = vsel %vm1258_vm10, %v1251_v52, %v1253_v34 }
 0x344   : > { %1385 = vrot.lane.b32.xlu0 %v1318_v48, %s1829_s9  ;;  %1371 = vrot.lane.b32.xlu2 %v1311_v56, %s1829_s9  ;;  %v1331_v26 = vadd.f32 %v1716_v2, %v1276_v21 }
 0x348   : > { %v1243_v11 = vpop.permute.xlu2 %1242 }
 0x349   : > { %v1272_v35 = vsel %vm1258_vm10, %v1241_v45, %v1243_v11 }
 0x34a   : > { %v1325_v8 = vadd.f32 %v1711_v23, %v1272_v35 }
 0x34c   : > { %1409 = vrot.lane.b32.xlu0 %v1330_v61, %s1829_s9  ;;  %1395 = vrot.lane.b32.xlu2 %v1323_v47, %s1829_s9 }
 0x34d   : > { %1399 = vrot.lane.b32.xlu1 %v1325_v8, %s1829_s9 }
 0x350   : > { %v1255_v53 = vpop.permute.xlu2 %1254 }
 0x351   : > { %v1277_v9 = vsel %vm1258_vm10, %v1253_v34, %v1255_v53 }
 0x354   : > { %1397 = vrot.lane.b32.xlu0 %v1324_v20, %s1829_s9  ;;  %1383 = vrot.lane.b32.xlu2 %v1317_v3, %s1829_s9 }
 0x35c   : > { %v1221_v5 = vpop.permute.xlu0 %1220 }
 0x35d   : > { %v1263_v59 = vsel %vm1258_vm10, %v1219_v17, %v1221_v5  ;;  %v1313_v18 = vadd.f32 %v1714_v32, %v1221_v5  ;;  %v1722_v17 = vld [vmem:[%s1935_s6 + $0xc8] sm:$0xff]  ;;  %s1636_s6 = smul.u32 192, %s1876_s16  ;;  %s1505_s16 = sshll.u32 %s2748_s26, 4  ;;  %s1506_s16 = int_to_ptr.vmem [resolvable:$true] %s1505_s16 }
 0x35e   : > { %v1312_v25 = vadd.f32 %v1715_v22, %v1263_v59  ;;  %v1332_v27 = vadd.f32 %v1722_v17, %v1277_v9 }
 0x35f   : > { %1375 = vrot.lane.b32.xlu1 %v1313_v18, %s1829_s9  ;;  %s1504_s27 = scalar_lea.hbm %s2837_s3, %s1636_s6 }
 0x360   : > { %1373 = vrot.lane.b32.xlu0 %v1312_v25, %s1829_s9  ;;  %s1507_s29 = sshll.u32 %s1504_s27, 4  ;;  %s1508_s29 = int_to_ptr.hbm [resolvable:$true] %s1507_s29 }
 0x361   : > { %s1768_s22 = sshra.s32 %s1508_s29, 4  ;;  %s1769_s22 = int_to_ptr.hbm [resolvable:$true] %s1768_s22 }
 0x362   : > { %v1378_v0 = vpop.permute.xlu2 %1377  ;;  %s1770_s7 = scalar_lea.hbm %s1769_s22, 192  ;;  %p1775_p3 = scmp.lt.s32.totalorder %s1769_s22, %s2837_s3 }
 0x363   : > { %p1771_p6 = scmp.ne.s32.totalorder %s1769_s22, %s1770_s7  ;;  %p1776_p4 = scmp.lt.s32.totalorder %s1774_s4, %s1770_s7 }
 0x364   : > { %v1233_v54 = vpop.permute.xlu0 %1232 }
 0x365   : > { %v1320_v15 = vadd.f32 %v1717_v40, %v1233_v54  ;;  %v1268_v10 = vsel %vm1258_vm10, %v1231_v13, %v1233_v54  ;;  %p1772_p13 = pnand %p1771_p6, %p1901_p11  ;;  %p1777_p5 = por %p1776_p4, %p1775_p3 }
 0x366   : > { %v1319_v38 = vadd.f32 %v1718_v43, %v1268_v10 }
 0x367   : > { %1411 = vrot.lane.b32.xlu1 %v1331_v26, %s1829_s9  ;;  %1389 = vrot.lane.b32.xlu2 %v1320_v15, %s1829_s9  ;;  %p1773_p2 = pneg %p1772_p13 }
 0x369   : > { %p1778_p7 = pnand %p1777_p5, %p1773_p2 }
 0x36a   : > { %v1366_v30 = vpop.permute.xlu2 %1365 }
 0x36c   : > { %v1245_v49 = vpop.permute.xlu0 %1244 }
 0x36d   : > { %v1273_v4 = vsel %vm1258_vm10, %v1243_v11, %v1245_v49  ;;  %v1327_v33 = vadd.f32 %v1719_v29, %v1245_v49 }
 0x36e   : > { %v1326_v24 = vadd.f32 %v1720_v57, %v1273_v4 }
 0x36f   : > { %1387 = vrot.lane.b32.xlu1 %v1319_v38, %s1829_s9  ;;  %1403 = vrot.lane.b32.xlu0 %v1327_v33, %s1829_s9 }
 0x370   : > { %1401 = vrot.lane.b32.xlu2 %v1326_v24, %s1829_s9 }
 0x372   : > { %v1364_v51 = vpop.permute.xlu1 %1363 }
 0x373   : > { %v1420_v6 = vsel %vm521_vm6, %v1364_v51, %v1366_v30 }
 0x374   : > { %v1257_v16 = vpop.permute.xlu0 %1256  ;;  %1468 = vst [vmem:[%s2748_s26] sm:$0xff] %v1420_v6 }
 0x375   : > { %v1278_v44 = vsel %vm1258_vm10, %v1255_v53, %v1257_v16  ;;  %v1334_v31 = vadd.f32 %v1721_v46, %v1257_v16 }
 0x376   : > { %v1333_v1 = vadd.f32 %v1723_v19, %v1278_v44 }
 0x377   : > { %1417 = vrot.lane.b32.xlu1 %v1334_v31, %s1829_s9 }
 0x378   : > { %1413 = vrot.lane.b32.xlu2 %v1332_v27, %s1829_s9  ;;  %1415 = vrot.lane.b32.xlu0 %v1333_v1, %s1829_s9 }
 0x382   : > { %v1392_v28 = vpop.permute.xlu0 %1391 }
 0x38a   : > { %v1380_v39 = vpop.permute.xlu0 %1379  ;;  %v1406_v62 = vpop.permute.xlu1 %1405 }
 0x38b   : > { %v1426_v50 = vsel %vm521_vm6, %v1378_v0, %v1380_v39 }
 0x38c   : > { %1474 = vst [vmem:[%s2748_s26 + $0x30] sm:$0xff] %v1426_v50 }
 0x392   : > { %v1368_v13 = vpop.permute.xlu0 %1367  ;;  %v1394_v58 = vpop.permute.xlu1 %1393 }
 0x393   : > { %v1421_v41 = vsel %vm521_vm6, %v1366_v30, %v1368_v13  ;;  %v1432_v56 = vsel %vm521_vm6, %v1392_v28, %v1394_v58 }
 0x394   : > { %1469 = vst [vmem:[%s2748_s26 + $0x8] sm:$0xff] %v1421_v41 }
 0x395   : > { %1480 = vst [vmem:[%s2748_s26 + $0x60] sm:$0xff] %v1432_v56 }
 0x396   : > { %v1408_v63 = vpop.permute.xlu2 %1407 }
 0x397   : > { %v1438_v48 = vsel %vm521_vm6, %v1406_v62, %v1408_v63 }
 0x398   : > { %1486 = vst [vmem:[%s2748_s26 + $0x90] sm:$0xff] %v1438_v48 }
 0x39a   : > { %v1382_v52 = vpop.permute.xlu1 %1381 }
 0x39b   : > { %v1427_v60 = vsel %vm521_vm6, %v1380_v39, %v1382_v52 }
 0x39c   : > { %1475 = vst [vmem:[%s2748_s26 + $0x38] sm:$0xff] %v1427_v60 }
 0x39e   : > { %v1372_v55 = vpop.permute.xlu2 %1371 }
 0x3a2   : > { %v1370_v45 = vpop.permute.xlu1 %1369 }
 0x3a3   : > { %v1422_v11 = vsel %vm521_vm6, %v1368_v13, %v1370_v45  ;;  %v1423_v35 = vsel %vm521_vm6, %v1370_v45, %v1372_v55 }
 0x3a4   : > { %1470 = vst [vmem:[%s2748_s26 + $0x10] sm:$0xff] %v1422_v11 }
 0x3a5   : > { %1471 = vst [vmem:[%s2748_s26 + $0x18] sm:$0xff] %v1423_v35 }
 0x3a6   : > { %v1396_v12 = vpop.permute.xlu2 %1395 }
 0x3a7   : > { %v1433_v47 = vsel %vm521_vm6, %v1394_v58, %v1396_v12 }
 0x3a8   : > { %1481 = vst [vmem:[%s2748_s26 + $0x68] sm:$0xff] %v1433_v47 }
 0x3ae   : > { %v1384_v36 = vpop.permute.xlu2 %1383 }
 0x3af   : > { %v1428_v61 = vsel %vm521_vm6, %v1382_v52, %v1384_v36 }
 0x3b0   : > { %1476 = vst [vmem:[%s2748_s26 + $0x40] sm:$0xff] %v1428_v61 }
 0x3b6   : > { %v1386_v23 = vpop.permute.xlu0 %1385 }
 0x3b7   : > { %v1429_v8 = vsel %vm521_vm6, %v1384_v36, %v1386_v23 }
 0x3b8   : > { %1477 = vst [vmem:[%s2748_s26 + $0x48] sm:$0xff] %v1429_v8 }
 0x3be   : > { %v1410_v37 = vpop.permute.xlu0 %1409 }
 0x3bf   : > { %v1439_v42 = vsel %vm521_vm6, %v1408_v63, %v1410_v37  ;;  %v1400_v3 = vpop.permute.xlu1 %1399 }
 0x3c0   : > { %1487 = vst [vmem:[%s2748_s26 + $0x98] sm:$0xff] %v1439_v42 }
 0x3c1   : > { %v1390_v7 = vpop.permute.xlu2 %1389 }
 0x3c6   : > { %v1398_v14 = vpop.permute.xlu0 %1397 }
 0x3c7   : > { %v1434_v20 = vsel %vm521_vm6, %v1396_v12, %v1398_v14  ;;  %v1435_v5 = vsel %vm521_vm6, %v1398_v14, %v1400_v3 }
 0x3c8   : > { %1482 = vst [vmem:[%s2748_s26 + $0x70] sm:$0xff] %v1434_v20 }
 0x3c9   : > { %1483 = vst [vmem:[%s2748_s26 + $0x78] sm:$0xff] %v1435_v5 }
 0x3ca   : > { %v1402_v59 = vpop.permute.xlu2 %1401 }
 0x3cb   : > { %v1436_v32 = vsel %vm521_vm6, %v1400_v3, %v1402_v59 }
 0x3cc   : > { %1484 = vst [vmem:[%s2748_s26 + $0x80] sm:$0xff] %v1436_v32 }
 0x3d1   : > { %v1376_v18 = vpop.permute.xlu1 %1375 }
 0x3d2   : > { %v1374_v22 = vpop.permute.xlu0 %1373  ;;  %v1414_v53 = vpop.permute.xlu2 %1413 }
 0x3d3   : > { %v1424_v25 = vsel %vm521_vm6, %v1372_v55, %v1374_v22  ;;  %v1425_v34 = vsel %vm521_vm6, %v1374_v22, %v1376_v18 }
 0x3d4   : > { %1472 = vst [vmem:[%s2748_s26 + $0x20] sm:$0xff] %v1424_v25 }
 0x3d5   : > { %1473 = vst [vmem:[%s2748_s26 + $0x28] sm:$0xff] %v1425_v34 }
 0x3d9   : > { %v1412_v21 = vpop.permute.xlu1 %1411 }
 0x3da   : > { %v1440_v54 = vsel %vm521_vm6, %v1410_v37, %v1412_v21  ;;  %v1441_v2 = vsel %vm521_vm6, %v1412_v21, %v1414_v53 }
 0x3db   : > { %1488 = vst [vmem:[%s2748_s26 + $0xa0] sm:$0xff] %v1440_v54 }
 0x3dc   : > { %1489 = vst [vmem:[%s2748_s26 + $0xa8] sm:$0xff] %v1441_v2 }
 0x3e1   : > { %v1388_v26 = vpop.permute.xlu1 %1387  ;;  %v1404_v40 = vpop.permute.xlu0 %1403 }
 0x3e2   : > { %v1430_v15 = vsel %vm521_vm6, %v1386_v23, %v1388_v26  ;;  %v1431_v0 = vsel %vm521_vm6, %v1388_v26, %v1390_v7  ;;  %v1437_v10 = vsel %vm521_vm6, %v1402_v59, %v1404_v40 }
 0x3e3   : > { %1478 = vst [vmem:[%s2748_s26 + $0x50] sm:$0xff] %v1430_v15 }
 0x3e4   : > { %1479 = vst [vmem:[%s2748_s26 + $0x58] sm:$0xff] %v1431_v0 }
 0x3e5   : > { %1485 = vst [vmem:[%s2748_s26 + $0x88] sm:$0xff] %v1437_v10 }
 0x3e9   : > { %v1418_v49 = vpop.permute.xlu1 %1417 }
 0x3ea   : > { %v1416_v43 = vpop.permute.xlu0 %1415 }
 0x3eb   : > { %v1442_v38 = vsel %vm521_vm6, %v1414_v53, %v1416_v43  ;;  %v1443_v4 = vsel %vm521_vm6, %v1416_v43, %v1418_v49 }
 0x3ec   : > { %1490 = vst [vmem:[%s2748_s26 + $0xb0] sm:$0xff] %v1442_v38 }
 0x3ed   : > { %1491 = vst [vmem:[%s2748_s26 + $0xb8] sm:$0xff] %v1443_v4 }
 0x3ee   : > { %1781 = shalt.err (!%p1778_p7)
}
 0x3ef   : > { %s1833_s28 = smov 768   ;;  %s1834_s11 = smov 48  }
 0x3f0   : > { %1639 = dma.vmem_to_hbm [thread:$0]  (%p1901_p11), %s1506_s16, 3072, %s1508_s29, %s1493_s30, %s1833_s28, %s1833_s28, %s1834_s11  }
 0x3f1 PF: > { %s1522_s19 = sand.u32 1, %s1808_s12   ;;  %p1646_p8 = pnand %p1583_p9, %p1905_p12 }
 0x3f2   : > { %s1523_s20 = scalar_lea.sflag [#allocation4], %s1522_s19 }
 0x3f3   : > { %p1647_p10 = pneg %p1646_p8 }
 0x3f5   : > { %1803 = dma.done.wait (%p1647_p10), %s1523_s20, 3072  }
 0x3f6   : > { %1805 = vsyncadd (%p1647_p10), %s1523_s20, 4294964224  ;;  %p16_p0 = scmp.ge.s32.totalorder %s1880_s18, 4   ;;  %s2842_s12 = smov %s1812_s13 }
 0x3f7   : > { %s2843_s13 = smov %s1816_s14  ;;  %s2844_s14 = smov %s1892_s21 }
 0x3f8   : > { %s2845_s15 = smov %s1880_s18  ;;  %18 = sbr.rel (!%p16_p0) target bundleno = 5 (0x5), region = 77 }
 0x3fd   :  { %1529 = vsyncpa [#allocation3], 1 }
 0x3fe   :  { %1531 = vsyncpa [#allocation3 + $0x1], 1 }
 0x3ff   :  { %1532 = vsyncpa [#allocation4], 1 }
 0x400   :  { %1534 = vsyncpa [#allocation4 + $0x1], 1 }

</bundles_post_ra>
